<compile_context>
chip_gen: v7x
topology: tpu7x:2x2x1
jax: 0.10.0
libtpu: 0.0.40
codegen_flags: <defaults>
</compile_context>

<pallas_src>
import functools

import jax
import jax.numpy as jnp
from jax import lax
from jax.experimental import pallas as pl
from jax.experimental.pallas import tpu as pltpu


def _head_attention(e_src_col, e_dst_row, h_head, alpha):
    """Dense-graph GAT attention for one head.

    e_src_col : (N, 1)  a_src . h_i  (column layout)
    e_dst_row : (1, N)  a_dst . h_j  (row layout -- avoids in-kernel transpose)
    h_head    : (N, F)  projected features for this head
    returns     (N, F)  softmax_j(LeakyReLU(e)) @ h_head
    """
    e = e_src_col + e_dst_row                       # (N, N) pairwise scores
    e = jnp.where(e > 0.0, e, alpha * e)            # LeakyReLU(alpha)
    # GAT.forward uses adj = ones((N, N)); where(adj > 0, e, -9e15) is an
    # exact no-op, so the adjacency input/mask is omitted entirely.
    m = jnp.max(e, axis=1, keepdims=True)           # (N, 1) row max
    p = jnp.exp(e - m)                              # unnormalized probabilities
    s = jnp.sum(p, axis=1, keepdims=True)           # (N, 1) row sums
    hp = jnp.dot(p, h_head, preferred_element_type=jnp.float32)   # (N, F)
    # Normalize AFTER the matmul: N*F multiplies instead of N*N divides; the
    # reciprocal runs on the otherwise-idle EUP slot.
    return hp * pl.reciprocal(s, approx=True)


def _elu(v):
    # ELU(alpha=1): v if v > 0 else exp(v) - 1  (min() keeps exp in-range)
    return jnp.where(v > 0.0, v, jnp.exp(jnp.minimum(v, 0.0)) - 1.0)


def _gat_forward_kernel(*refs, alpha, nheads, nhid, nclass, has_mask):
    """Whole GAT forward (2 layers x nheads heads) in one kernel invocation."""
    if has_mask:
        (x_ref, w1_ref, a1s_ref, a1d_ref,
         w2_ref, a2s_ref, a2d_ref, mask_ref, out_ref) = refs
    else:
        (x_ref, w1_ref, a1s_ref, a1d_ref,
         w2_ref, a2s_ref, a2d_ref, out_ref) = refs
        mask_ref = None

    f32 = jnp.float32
    x = x_ref[...]                                   # (N, Fin)
    N = x.shape[0]
    H = nheads

    # ---- layer 1: all heads projected with one wide MXU matmul --------------
    h1 = jnp.dot(x, w1_ref[...], preferred_element_type=f32)      # (N, H*nhid)
    es1 = jnp.dot(x, a1s_ref[...], preferred_element_type=f32)    # (N, H)
    ed1 = lax.dot_general(a1d_ref[...], x,                        # (H, N)
                          (((1,), (1,)), ((), ())),               # contract feat
                          preferred_element_type=f32)

    # Per-head attention + ELU (concat=True path); static unroll, H is small.
    x1_heads = []
    for h in range(H):
        lo, hi = h * nhid, (h + 1) * nhid
        x1_h = _head_attention(es1[:, h:h + 1], ed1[h:h + 1, :],
                               h1[:, lo:hi], alpha)
        x1_heads.append(_elu(x1_h))
    # Materialize the concatenated layer-1 output (N, H*nhid) in VMEM so the
    # layer-2 projections are single 128-deep MXU contractions.
    x1 = jnp.concatenate(x1_heads, axis=1)

    # ---- layer 2 projections: one wide matmul each ---------------------------
    h2 = jnp.dot(x1, w2_ref[...], preferred_element_type=f32)     # (N, H*nclass)
    es2 = jnp.dot(x1, a2s_ref[...], preferred_element_type=f32)   # (N, H)
    ed2 = lax.dot_general(a2d_ref[...], x1,                       # (H, N)
                          (((1,), (1,)), ((), ())),
                          preferred_element_type=f32)

    # ---- layer 2: per-head attention, averaged over heads (no ELU) ----------
    acc = jnp.zeros((N, nclass), f32)
    for h in range(H):
        lo, hi = h * nclass, (h + 1) * nclass
        acc = acc + _head_attention(es2[:, h:h + 1], ed2[h:h + 1, :],
                                    h2[:, lo:hi], alpha)
    out = acc * (1.0 / H)

    # Fused optional action masking (available_actions == 0 -> -1e10).
    if mask_ref is not None:
        out = jnp.where(mask_ref[...] == 0, jnp.float32(-1e10), out)
    out_ref[...] = out


def _fold_attention_weights(W, a):
    """Per-head W:(H,Fin,Fout), a:(H,2*Fout,1) -> kernel-ready operands.

    Returns:
      Wcat    (Fin, H*Fout)  head h occupies columns [h*Fout, (h+1)*Fout)
      A_src   (Fin, H)       column h = W_h @ a_h[:Fout]   (x @ A_src = e_src)
      A_dst_t (H, Fin)       row h    = W_h @ a_h[Fout:]   (row layout for e_dst)
    Folding a into W turns the 1-column attention matvecs into ordinary
    columns of the projection matmul (exact: x @ (W @ a) == (x @ W) @ a).
    """
    H, Fin, Fout = W.shape
    Wcat = jnp.transpose(W, (1, 0, 2)).reshape(Fin, H * Fout)
    a_src = a[:, :Fout, 0]                           # (H, Fout)
    a_dst = a[:, Fout:, 0]                           # (H, Fout)
    A_src = jnp.einsum("hfo,ho->fh", W, a_src)       # (Fin, H)
    A_dst_t = jnp.einsum("hfo,ho->hf", W, a_dst)     # (H, Fin)
    return Wcat, A_src, A_dst_t


def categorical_topk_gat_forward(x, params, *, alpha, available_actions=None):
    """Categorical_Topk_GAT.forward: logits = GAT(x), optional action masking
    (mask fused into the kernel)."""
    N = x.shape[0]
    W1, a1 = params["W1"], params["a1"]
    W2, a2 = params["W2"], params["a2"]
    H, _, nhid = W1.shape
    nclass = W2.shape[2]

    w1c, a1s, a1d = _fold_attention_weights(W1, a1)
    w2c, a2s, a2d = _fold_attention_weights(W2, a2)

    inputs = [x, w1c, a1s, a1d, w2c, a2s, a2d]
    has_mask = available_actions is not None
    if has_mask:
        inputs.append(available_actions)

    kernel = functools.partial(_gat_forward_kernel, alpha=alpha, nheads=H,
                               nhid=nhid, nclass=nclass, has_mask=has_mask)

    # Single grid-less invocation: every operand is a whole-array VMEM block.
    # TODO(synk): for large N (thousands of nodes) this should tile query rows
    # with an online softmax instead of materializing (N, N) scores in VMEM.
    return pl.pallas_call(
        kernel,
        out_shape=jax.ShapeDtypeStruct((N, nclass), jnp.float32),
        in_specs=[pl.BlockSpec(memory_space=pltpu.MemorySpace.VMEM)
                  for _ in inputs],
        out_specs=pl.BlockSpec(memory_space=pltpu.MemorySpace.VMEM),
    )(*inputs)


def _xavier_uniform(key, shape):
    fan_in, fan_out = shape[-2], shape[-1]
    bound = (6.0 / (fan_in + fan_out)) ** 0.5
    return jax.random.uniform(key, shape, jnp.float32, -bound, bound)


def init_gat_params(key, nfeat, nhid, nclass, nheads):
    k = jax.random.split(key, 4)
    W1 = jnp.stack([_xavier_uniform(kk, (nfeat, nhid))
                    for kk in jax.random.split(k[0], nheads)])
    a1 = jnp.stack([_xavier_uniform(kk, (2 * nhid, 1))
                    for kk in jax.random.split(k[1], nheads)])
    W2 = jnp.stack([_xavier_uniform(kk, (nhid * nheads, nclass))
                    for kk in jax.random.split(k[2], nheads)])
    a2 = jnp.stack([_xavier_uniform(kk, (2 * nclass, 1))
                    for kk in jax.random.split(k[3], nheads)])
    return {"W1": W1, "a1": a1, "W2": W2, "a2": a2}


if __name__ == "__main__":
    # Small shapes matching the default (non-"nanshan") Categorical_Topk_GAT
    # config: nhid=16, nheads=8; N=8 graph nodes, nfeat=16, nclass=8 actions.
    N, nfeat, nhid, nclass, nheads = 8, 16, 16, 8, 8
    alpha = 0.2  # LeakyReLU negative slope
    # TODO(synk): dropout (p=0.6) is identity in eval mode; training-mode
    # dropout would need pltpu.prng_* inside the kernel.
    # NOTE: matmuls are kept in f32 for exact parity; casting h/p to bf16 is a
    # further MXU-throughput option once numerics are validated.

    key = jax.random.PRNGKey(0)
    kx, kp, km = jax.random.split(key, 3)
    x = jax.random.normal(kx, (N, nfeat), jnp.float32)
    params = init_gat_params(kp, nfeat, nhid, nclass, nheads)

    # Unmasked path.
    fwd = jax.jit(functools.partial(categorical_topk_gat_forward, alpha=alpha))
    out = fwd(x, params)
    jax.block_until_ready(out)
    assert out.shape == (N, nclass)
    assert bool(jnp.all(jnp.isfinite(out)))

    # Masked path (available_actions fused into the kernel epilogue).
    avail = jax.random.bernoulli(km, 0.7, (N, nclass)).astype(jnp.int32)
    fwd_m = jax.jit(
        functools.partial(categorical_topk_gat_forward, alpha=alpha))
    out_m = fwd_m(x, params, available_actions=avail)
    jax.block_until_ready(out_m)
    assert out_m.shape == (N, nclass)
    assert bool(jnp.all(jnp.isfinite(out_m)))
    assert bool(jnp.all(jnp.where(avail == 0, out_m <= -1e9, True)))

    print("KERNEL_OK")
</pallas_src>

<mosaic_0001>
module attributes {stable_mosaic.version = 11 : i64} {
  func.func @_gat_forward_kernel(%arg0: memref<8x16xf32, #tpu.memory_space<vmem>>, %arg1: memref<16x128xf32, #tpu.memory_space<vmem>>, %arg2: memref<16x8xf32, #tpu.memory_space<vmem>>, %arg3: memref<8x16xf32, #tpu.memory_space<vmem>>, %arg4: memref<128x64xf32, #tpu.memory_space<vmem>>, %arg5: memref<128x8xf32, #tpu.memory_space<vmem>>, %arg6: memref<8x128xf32, #tpu.memory_space<vmem>>, %arg7: memref<8x8xf32, #tpu.memory_space<vmem>>) attributes {dimension_semantics = [], scalar_prefetch = 0 : i64, scratch_operands = 0 : i64, tpu.core_type = #tpu.core_type<tc>} {
    %c0 = arith.constant 0 : index
    %c0_0 = arith.constant 0 : index
    %0 = vector.load %arg0[%c0, %c0_0] : memref<8x16xf32, #tpu.memory_space<vmem>>, vector<8x16xf32>
    %c0_1 = arith.constant 0 : index
    %c0_2 = arith.constant 0 : index
    %1 = vector.load %arg1[%c0_1, %c0_2] : memref<16x128xf32, #tpu.memory_space<vmem>>, vector<16x128xf32>
    %cst = arith.constant dense<0.000000e+00> : vector<8x128xf32>
    %2 = tpu.matmul %0, %1, %cst {dimension_numbers = #tpu.dot_dimension_numbers<[1], [0], [0], [1], [0, 0, 1, 1], [], []>} : vector<8x16xf32>, vector<16x128xf32>, vector<8x128xf32> -> vector<8x128xf32>
    %c0_3 = arith.constant 0 : index
    %c0_4 = arith.constant 0 : index
    %3 = vector.load %arg2[%c0_3, %c0_4] : memref<16x8xf32, #tpu.memory_space<vmem>>, vector<16x8xf32>
    %cst_5 = arith.constant dense<0.000000e+00> : vector<8x8xf32>
    %4 = tpu.matmul %0, %3, %cst_5 {dimension_numbers = #tpu.dot_dimension_numbers<[1], [0], [0], [1], [0, 0, 1, 1], [], []>} : vector<8x16xf32>, vector<16x8xf32>, vector<8x8xf32> -> vector<8x8xf32>
    %c0_6 = arith.constant 0 : index
    %c0_7 = arith.constant 0 : index
    %5 = vector.load %arg3[%c0_6, %c0_7] : memref<8x16xf32, #tpu.memory_space<vmem>>, vector<8x16xf32>
    %cst_8 = arith.constant dense<0.000000e+00> : vector<8x8xf32>
    %6 = tpu.matmul %5, %0, %cst_8 {dimension_numbers = #tpu.dot_dimension_numbers<[1], [1], [0], [0], [0, 0, 1, 0], [], []>} : vector<8x16xf32>, vector<8x16xf32>, vector<8x8xf32> -> vector<8x8xf32>
    %7 = vector.extract_strided_slice %4 {offsets = [0, 0], sizes = [8, 1], strides = [1, 1]} : vector<8x8xf32> to vector<8x1xf32>
    %8 = vector.extract_strided_slice %6 {offsets = [0, 0], sizes = [1, 8], strides = [1, 1]} : vector<8x8xf32> to vector<1x8xf32>
    %9 = vector.extract_strided_slice %2 {offsets = [0, 0], sizes = [8, 16], strides = [1, 1]} : vector<8x128xf32> to vector<8x16xf32>
    %10 = vector.broadcast %7 : vector<8x1xf32> to vector<8x8xf32>
    %11 = vector.broadcast %8 : vector<1x8xf32> to vector<8x8xf32>
    %12 = arith.addf %10, %11 : vector<8x8xf32>
    %cst_9 = arith.constant 0.000000e+00 : f32
    %13 = vector.broadcast %cst_9 : f32 to vector<8x8xf32>
    %14 = arith.cmpf ogt, %12, %13 : vector<8x8xf32>
    %cst_10 = arith.constant 2.000000e-01 : f32
    %15 = vector.broadcast %cst_10 : f32 to vector<8x8xf32>
    %16 = arith.mulf %15, %12 : vector<8x8xf32>
    %17 = arith.select %14, %12, %16 : vector<8x8xi1>, vector<8x8xf32>
    %cst_11 = arith.constant dense<0xFF800000> : vector<8xf32>
    %18 = vector.multi_reduction <maximumf>, %17, %cst_11 [1] : vector<8x8xf32> to vector<8xf32>
    %19 = vector.shape_cast %18 : vector<8xf32> to vector<8x1xf32>
    %20 = vector.broadcast %19 : vector<8x1xf32> to vector<8x8xf32>
    %21 = arith.subf %17, %20 : vector<8x8xf32>
    %22 = math.exp %21 : vector<8x8xf32>
    %cst_12 = arith.constant dense<0.000000e+00> : vector<8xf32>
    %23 = vector.multi_reduction <add>, %22, %cst_12 [1] : vector<8x8xf32> to vector<8xf32>
    %24 = vector.shape_cast %23 : vector<8xf32> to vector<8x1xf32>
    %cst_13 = arith.constant dense<0.000000e+00> : vector<8x16xf32>
    %25 = tpu.matmul %22, %9, %cst_13 {dimension_numbers = #tpu.dot_dimension_numbers<[1], [0], [0], [1], [0, 0, 1, 1], [], []>} : vector<8x8xf32>, vector<8x16xf32>, vector<8x16xf32> -> vector<8x16xf32>
    %26 = tpu.reciprocal %24 {approx = true} : vector<8x1xf32> -> vector<8x1xf32>
    %27 = vector.broadcast %26 : vector<8x1xf32> to vector<8x16xf32>
    %28 = arith.mulf %25, %27 : vector<8x16xf32>
    %cst_14 = arith.constant 0.000000e+00 : f32
    %29 = vector.broadcast %cst_14 : f32 to vector<8x16xf32>
    %30 = arith.cmpf ogt, %28, %29 : vector<8x16xf32>
    %cst_15 = arith.constant 0.000000e+00 : f32
    %31 = vector.broadcast %cst_15 : f32 to vector<8x16xf32>
    %32 = arith.minimumf %28, %31 : vector<8x16xf32>
    %33 = math.exp %32 : vector<8x16xf32>
    %cst_16 = arith.constant 1.000000e+00 : f32
    %34 = vector.broadcast %cst_16 : f32 to vector<8x16xf32>
    %35 = arith.subf %33, %34 : vector<8x16xf32>
    %36 = arith.select %30, %28, %35 : vector<8x16xi1>, vector<8x16xf32>
    %37 = vector.extract_strided_slice %4 {offsets = [0, 1], sizes = [8, 1], strides = [1, 1]} : vector<8x8xf32> to vector<8x1xf32>
    %38 = vector.extract_strided_slice %6 {offsets = [1, 0], sizes = [1, 8], strides = [1, 1]} : vector<8x8xf32> to vector<1x8xf32>
    %39 = vector.extract_strided_slice %2 {offsets = [0, 16], sizes = [8, 16], strides = [1, 1]} : vector<8x128xf32> to vector<8x16xf32>
    %40 = vector.broadcast %37 : vector<8x1xf32> to vector<8x8xf32>
    %41 = vector.broadcast %38 : vector<1x8xf32> to vector<8x8xf32>
    %42 = arith.addf %40, %41 : vector<8x8xf32>
    %cst_17 = arith.constant 0.000000e+00 : f32
    %43 = vector.broadcast %cst_17 : f32 to vector<8x8xf32>
    %44 = arith.cmpf ogt, %42, %43 : vector<8x8xf32>
    %cst_18 = arith.constant 2.000000e-01 : f32
    %45 = vector.broadcast %cst_18 : f32 to vector<8x8xf32>
    %46 = arith.mulf %45, %42 : vector<8x8xf32>
    %47 = arith.select %44, %42, %46 : vector<8x8xi1>, vector<8x8xf32>
    %cst_19 = arith.constant dense<0xFF800000> : vector<8xf32>
    %48 = vector.multi_reduction <maximumf>, %47, %cst_19 [1] : vector<8x8xf32> to vector<8xf32>
    %49 = vector.shape_cast %48 : vector<8xf32> to vector<8x1xf32>
    %50 = vector.broadcast %49 : vector<8x1xf32> to vector<8x8xf32>
    %51 = arith.subf %47, %50 : vector<8x8xf32>
    %52 = math.exp %51 : vector<8x8xf32>
    %cst_20 = arith.constant dense<0.000000e+00> : vector<8xf32>
    %53 = vector.multi_reduction <add>, %52, %cst_20 [1] : vector<8x8xf32> to vector<8xf32>
    %54 = vector.shape_cast %53 : vector<8xf32> to vector<8x1xf32>
    %cst_21 = arith.constant dense<0.000000e+00> : vector<8x16xf32>
    %55 = tpu.matmul %52, %39, %cst_21 {dimension_numbers = #tpu.dot_dimension_numbers<[1], [0], [0], [1], [0, 0, 1, 1], [], []>} : vector<8x8xf32>, vector<8x16xf32>, vector<8x16xf32> -> vector<8x16xf32>
    %56 = tpu.reciprocal %54 {approx = true} : vector<8x1xf32> -> vector<8x1xf32>
    %57 = vector.broadcast %56 : vector<8x1xf32> to vector<8x16xf32>
    %58 = arith.mulf %55, %57 : vector<8x16xf32>
    %cst_22 = arith.constant 0.000000e+00 : f32
    %59 = vector.broadcast %cst_22 : f32 to vector<8x16xf32>
    %60 = arith.cmpf ogt, %58, %59 : vector<8x16xf32>
    %cst_23 = arith.constant 0.000000e+00 : f32
    %61 = vector.broadcast %cst_23 : f32 to vector<8x16xf32>
    %62 = arith.minimumf %58, %61 : vector<8x16xf32>
    %63 = math.exp %62 : vector<8x16xf32>
    %cst_24 = arith.constant 1.000000e+00 : f32
    %64 = vector.broadcast %cst_24 : f32 to vector<8x16xf32>
    %65 = arith.subf %63, %64 : vector<8x16xf32>
    %66 = arith.select %60, %58, %65 : vector<8x16xi1>, vector<8x16xf32>
    %67 = vector.extract_strided_slice %4 {offsets = [0, 2], sizes = [8, 1], strides = [1, 1]} : vector<8x8xf32> to vector<8x1xf32>
    %68 = vector.extract_strided_slice %6 {offsets = [2, 0], sizes = [1, 8], strides = [1, 1]} : vector<8x8xf32> to vector<1x8xf32>
    %69 = vector.extract_strided_slice %2 {offsets = [0, 32], sizes = [8, 16], strides = [1, 1]} : vector<8x128xf32> to vector<8x16xf32>
    %70 = vector.broadcast %67 : vector<8x1xf32> to vector<8x8xf32>
    %71 = vector.broadcast %68 : vector<1x8xf32> to vector<8x8xf32>
    %72 = arith.addf %70, %71 : vector<8x8xf32>
    %cst_25 = arith.constant 0.000000e+00 : f32
    %73 = vector.broadcast %cst_25 : f32 to vector<8x8xf32>
    %74 = arith.cmpf ogt, %72, %73 : vector<8x8xf32>
    %cst_26 = arith.constant 2.000000e-01 : f32
    %75 = vector.broadcast %cst_26 : f32 to vector<8x8xf32>
    %76 = arith.mulf %75, %72 : vector<8x8xf32>
    %77 = arith.select %74, %72, %76 : vector<8x8xi1>, vector<8x8xf32>
    %cst_27 = arith.constant dense<0xFF800000> : vector<8xf32>
    %78 = vector.multi_reduction <maximumf>, %77, %cst_27 [1] : vector<8x8xf32> to vector<8xf32>
    %79 = vector.shape_cast %78 : vector<8xf32> to vector<8x1xf32>
    %80 = vector.broadcast %79 : vector<8x1xf32> to vector<8x8xf32>
    %81 = arith.subf %77, %80 : vector<8x8xf32>
    %82 = math.exp %81 : vector<8x8xf32>
    %cst_28 = arith.constant dense<0.000000e+00> : vector<8xf32>
    %83 = vector.multi_reduction <add>, %82, %cst_28 [1] : vector<8x8xf32> to vector<8xf32>
    %84 = vector.shape_cast %83 : vector<8xf32> to vector<8x1xf32>
    %cst_29 = arith.constant dense<0.000000e+00> : vector<8x16xf32>
    %85 = tpu.matmul %82, %69, %cst_29 {dimension_numbers = #tpu.dot_dimension_numbers<[1], [0], [0], [1], [0, 0, 1, 1], [], []>} : vector<8x8xf32>, vector<8x16xf32>, vector<8x16xf32> -> vector<8x16xf32>
    %86 = tpu.reciprocal %84 {approx = true} : vector<8x1xf32> -> vector<8x1xf32>
    %87 = vector.broadcast %86 : vector<8x1xf32> to vector<8x16xf32>
    %88 = arith.mulf %85, %87 : vector<8x16xf32>
    %cst_30 = arith.constant 0.000000e+00 : f32
    %89 = vector.broadcast %cst_30 : f32 to vector<8x16xf32>
    %90 = arith.cmpf ogt, %88, %89 : vector<8x16xf32>
    %cst_31 = arith.constant 0.000000e+00 : f32
    %91 = vector.broadcast %cst_31 : f32 to vector<8x16xf32>
    %92 = arith.minimumf %88, %91 : vector<8x16xf32>
    %93 = math.exp %92 : vector<8x16xf32>
    %cst_32 = arith.constant 1.000000e+00 : f32
    %94 = vector.broadcast %cst_32 : f32 to vector<8x16xf32>
    %95 = arith.subf %93, %94 : vector<8x16xf32>
    %96 = arith.select %90, %88, %95 : vector<8x16xi1>, vector<8x16xf32>
    %97 = vector.extract_strided_slice %4 {offsets = [0, 3], sizes = [8, 1], strides = [1, 1]} : vector<8x8xf32> to vector<8x1xf32>
    %98 = vector.extract_strided_slice %6 {offsets = [3, 0], sizes = [1, 8], strides = [1, 1]} : vector<8x8xf32> to vector<1x8xf32>
    %99 = vector.extract_strided_slice %2 {offsets = [0, 48], sizes = [8, 16], strides = [1, 1]} : vector<8x128xf32> to vector<8x16xf32>
    %100 = vector.broadcast %97 : vector<8x1xf32> to vector<8x8xf32>
    %101 = vector.broadcast %98 : vector<1x8xf32> to vector<8x8xf32>
    %102 = arith.addf %100, %101 : vector<8x8xf32>
    %cst_33 = arith.constant 0.000000e+00 : f32
    %103 = vector.broadcast %cst_33 : f32 to vector<8x8xf32>
    %104 = arith.cmpf ogt, %102, %103 : vector<8x8xf32>
    %cst_34 = arith.constant 2.000000e-01 : f32
    %105 = vector.broadcast %cst_34 : f32 to vector<8x8xf32>
    %106 = arith.mulf %105, %102 : vector<8x8xf32>
    %107 = arith.select %104, %102, %106 : vector<8x8xi1>, vector<8x8xf32>
    %cst_35 = arith.constant dense<0xFF800000> : vector<8xf32>
    %108 = vector.multi_reduction <maximumf>, %107, %cst_35 [1] : vector<8x8xf32> to vector<8xf32>
    %109 = vector.shape_cast %108 : vector<8xf32> to vector<8x1xf32>
    %110 = vector.broadcast %109 : vector<8x1xf32> to vector<8x8xf32>
    %111 = arith.subf %107, %110 : vector<8x8xf32>
    %112 = math.exp %111 : vector<8x8xf32>
    %cst_36 = arith.constant dense<0.000000e+00> : vector<8xf32>
    %113 = vector.multi_reduction <add>, %112, %cst_36 [1] : vector<8x8xf32> to vector<8xf32>
    %114 = vector.shape_cast %113 : vector<8xf32> to vector<8x1xf32>
    %cst_37 = arith.constant dense<0.000000e+00> : vector<8x16xf32>
    %115 = tpu.matmul %112, %99, %cst_37 {dimension_numbers = #tpu.dot_dimension_numbers<[1], [0], [0], [1], [0, 0, 1, 1], [], []>} : vector<8x8xf32>, vector<8x16xf32>, vector<8x16xf32> -> vector<8x16xf32>
    %116 = tpu.reciprocal %114 {approx = true} : vector<8x1xf32> -> vector<8x1xf32>
    %117 = vector.broadcast %116 : vector<8x1xf32> to vector<8x16xf32>
    %118 = arith.mulf %115, %117 : vector<8x16xf32>
    %cst_38 = arith.constant 0.000000e+00 : f32
    %119 = vector.broadcast %cst_38 : f32 to vector<8x16xf32>
    %120 = arith.cmpf ogt, %118, %119 : vector<8x16xf32>
    %cst_39 = arith.constant 0.000000e+00 : f32
    %121 = vector.broadcast %cst_39 : f32 to vector<8x16xf32>
    %122 = arith.minimumf %118, %121 : vector<8x16xf32>
    %123 = math.exp %122 : vector<8x16xf32>
    %cst_40 = arith.constant 1.000000e+00 : f32
    %124 = vector.broadcast %cst_40 : f32 to vector<8x16xf32>
    %125 = arith.subf %123, %124 : vector<8x16xf32>
    %126 = arith.select %120, %118, %125 : vector<8x16xi1>, vector<8x16xf32>
    %127 = vector.extract_strided_slice %4 {offsets = [0, 4], sizes = [8, 1], strides = [1, 1]} : vector<8x8xf32> to vector<8x1xf32>
    %128 = vector.extract_strided_slice %6 {offsets = [4, 0], sizes = [1, 8], strides = [1, 1]} : vector<8x8xf32> to vector<1x8xf32>
    %129 = vector.extract_strided_slice %2 {offsets = [0, 64], sizes = [8, 16], strides = [1, 1]} : vector<8x128xf32> to vector<8x16xf32>
    %130 = vector.broadcast %127 : vector<8x1xf32> to vector<8x8xf32>
    %131 = vector.broadcast %128 : vector<1x8xf32> to vector<8x8xf32>
    %132 = arith.addf %130, %131 : vector<8x8xf32>
    %cst_41 = arith.constant 0.000000e+00 : f32
    %133 = vector.broadcast %cst_41 : f32 to vector<8x8xf32>
    %134 = arith.cmpf ogt, %132, %133 : vector<8x8xf32>
    %cst_42 = arith.constant 2.000000e-01 : f32
    %135 = vector.broadcast %cst_42 : f32 to vector<8x8xf32>
    %136 = arith.mulf %135, %132 : vector<8x8xf32>
    %137 = arith.select %134, %132, %136 : vector<8x8xi1>, vector<8x8xf32>
    %cst_43 = arith.constant dense<0xFF800000> : vector<8xf32>
    %138 = vector.multi_reduction <maximumf>, %137, %cst_43 [1] : vector<8x8xf32> to vector<8xf32>
    %139 = vector.shape_cast %138 : vector<8xf32> to vector<8x1xf32>
    %140 = vector.broadcast %139 : vector<8x1xf32> to vector<8x8xf32>
    %141 = arith.subf %137, %140 : vector<8x8xf32>
    %142 = math.exp %141 : vector<8x8xf32>
    %cst_44 = arith.constant dense<0.000000e+00> : vector<8xf32>
    %143 = vector.multi_reduction <add>, %142, %cst_44 [1] : vector<8x8xf32> to vector<8xf32>
    %144 = vector.shape_cast %143 : vector<8xf32> to vector<8x1xf32>
    %cst_45 = arith.constant dense<0.000000e+00> : vector<8x16xf32>
    %145 = tpu.matmul %142, %129, %cst_45 {dimension_numbers = #tpu.dot_dimension_numbers<[1], [0], [0], [1], [0, 0, 1, 1], [], []>} : vector<8x8xf32>, vector<8x16xf32>, vector<8x16xf32> -> vector<8x16xf32>
    %146 = tpu.reciprocal %144 {approx = true} : vector<8x1xf32> -> vector<8x1xf32>
    %147 = vector.broadcast %146 : vector<8x1xf32> to vector<8x16xf32>
    %148 = arith.mulf %145, %147 : vector<8x16xf32>
    %cst_46 = arith.constant 0.000000e+00 : f32
    %149 = vector.broadcast %cst_46 : f32 to vector<8x16xf32>
    %150 = arith.cmpf ogt, %148, %149 : vector<8x16xf32>
    %cst_47 = arith.constant 0.000000e+00 : f32
    %151 = vector.broadcast %cst_47 : f32 to vector<8x16xf32>
    %152 = arith.minimumf %148, %151 : vector<8x16xf32>
    %153 = math.exp %152 : vector<8x16xf32>
    %cst_48 = arith.constant 1.000000e+00 : f32
    %154 = vector.broadcast %cst_48 : f32 to vector<8x16xf32>
    %155 = arith.subf %153, %154 : vector<8x16xf32>
    %156 = arith.select %150, %148, %155 : vector<8x16xi1>, vector<8x16xf32>
    %157 = vector.extract_strided_slice %4 {offsets = [0, 5], sizes = [8, 1], strides = [1, 1]} : vector<8x8xf32> to vector<8x1xf32>
    %158 = vector.extract_strided_slice %6 {offsets = [5, 0], sizes = [1, 8], strides = [1, 1]} : vector<8x8xf32> to vector<1x8xf32>
    %159 = vector.extract_strided_slice %2 {offsets = [0, 80], sizes = [8, 16], strides = [1, 1]} : vector<8x128xf32> to vector<8x16xf32>
    %160 = vector.broadcast %157 : vector<8x1xf32> to vector<8x8xf32>
    %161 = vector.broadcast %158 : vector<1x8xf32> to vector<8x8xf32>
    %162 = arith.addf %160, %161 : vector<8x8xf32>
    %cst_49 = arith.constant 0.000000e+00 : f32
    %163 = vector.broadcast %cst_49 : f32 to vector<8x8xf32>
    %164 = arith.cmpf ogt, %162, %163 : vector<8x8xf32>
    %cst_50 = arith.constant 2.000000e-01 : f32
    %165 = vector.broadcast %cst_50 : f32 to vector<8x8xf32>
    %166 = arith.mulf %165, %162 : vector<8x8xf32>
    %167 = arith.select %164, %162, %166 : vector<8x8xi1>, vector<8x8xf32>
    %cst_51 = arith.constant dense<0xFF800000> : vector<8xf32>
    %168 = vector.multi_reduction <maximumf>, %167, %cst_51 [1] : vector<8x8xf32> to vector<8xf32>
    %169 = vector.shape_cast %168 : vector<8xf32> to vector<8x1xf32>
    %170 = vector.broadcast %169 : vector<8x1xf32> to vector<8x8xf32>
    %171 = arith.subf %167, %170 : vector<8x8xf32>
    %172 = math.exp %171 : vector<8x8xf32>
    %cst_52 = arith.constant dense<0.000000e+00> : vector<8xf32>
    %173 = vector.multi_reduction <add>, %172, %cst_52 [1] : vector<8x8xf32> to vector<8xf32>
    %174 = vector.shape_cast %173 : vector<8xf32> to vector<8x1xf32>
    %cst_53 = arith.constant dense<0.000000e+00> : vector<8x16xf32>
    %175 = tpu.matmul %172, %159, %cst_53 {dimension_numbers = #tpu.dot_dimension_numbers<[1], [0], [0], [1], [0, 0, 1, 1], [], []>} : vector<8x8xf32>, vector<8x16xf32>, vector<8x16xf32> -> vector<8x16xf32>
    %176 = tpu.reciprocal %174 {approx = true} : vector<8x1xf32> -> vector<8x1xf32>
    %177 = vector.broadcast %176 : vector<8x1xf32> to vector<8x16xf32>
    %178 = arith.mulf %175, %177 : vector<8x16xf32>
    %cst_54 = arith.constant 0.000000e+00 : f32
    %179 = vector.broadcast %cst_54 : f32 to vector<8x16xf32>
    %180 = arith.cmpf ogt, %178, %179 : vector<8x16xf32>
    %cst_55 = arith.constant 0.000000e+00 : f32
    %181 = vector.broadcast %cst_55 : f32 to vector<8x16xf32>
    %182 = arith.minimumf %178, %181 : vector<8x16xf32>
    %183 = math.exp %182 : vector<8x16xf32>
    %cst_56 = arith.constant 1.000000e+00 : f32
    %184 = vector.broadcast %cst_56 : f32 to vector<8x16xf32>
    %185 = arith.subf %183, %184 : vector<8x16xf32>
    %186 = arith.select %180, %178, %185 : vector<8x16xi1>, vector<8x16xf32>
    %187 = vector.extract_strided_slice %4 {offsets = [0, 6], sizes = [8, 1], strides = [1, 1]} : vector<8x8xf32> to vector<8x1xf32>
    %188 = vector.extract_strided_slice %6 {offsets = [6, 0], sizes = [1, 8], strides = [1, 1]} : vector<8x8xf32> to vector<1x8xf32>
    %189 = vector.extract_strided_slice %2 {offsets = [0, 96], sizes = [8, 16], strides = [1, 1]} : vector<8x128xf32> to vector<8x16xf32>
    %190 = vector.broadcast %187 : vector<8x1xf32> to vector<8x8xf32>
    %191 = vector.broadcast %188 : vector<1x8xf32> to vector<8x8xf32>
    %192 = arith.addf %190, %191 : vector<8x8xf32>
    %cst_57 = arith.constant 0.000000e+00 : f32
    %193 = vector.broadcast %cst_57 : f32 to vector<8x8xf32>
    %194 = arith.cmpf ogt, %192, %193 : vector<8x8xf32>
    %cst_58 = arith.constant 2.000000e-01 : f32
    %195 = vector.broadcast %cst_58 : f32 to vector<8x8xf32>
    %196 = arith.mulf %195, %192 : vector<8x8xf32>
    %197 = arith.select %194, %192, %196 : vector<8x8xi1>, vector<8x8xf32>
    %cst_59 = arith.constant dense<0xFF800000> : vector<8xf32>
    %198 = vector.multi_reduction <maximumf>, %197, %cst_59 [1] : vector<8x8xf32> to vector<8xf32>
    %199 = vector.shape_cast %198 : vector<8xf32> to vector<8x1xf32>
    %200 = vector.broadcast %199 : vector<8x1xf32> to vector<8x8xf32>
    %201 = arith.subf %197, %200 : vector<8x8xf32>
    %202 = math.exp %201 : vector<8x8xf32>
    %cst_60 = arith.constant dense<0.000000e+00> : vector<8xf32>
    %203 = vector.multi_reduction <add>, %202, %cst_60 [1] : vector<8x8xf32> to vector<8xf32>
    %204 = vector.shape_cast %203 : vector<8xf32> to vector<8x1xf32>
    %cst_61 = arith.constant dense<0.000000e+00> : vector<8x16xf32>
    %205 = tpu.matmul %202, %189, %cst_61 {dimension_numbers = #tpu.dot_dimension_numbers<[1], [0], [0], [1], [0, 0, 1, 1], [], []>} : vector<8x8xf32>, vector<8x16xf32>, vector<8x16xf32> -> vector<8x16xf32>
    %206 = tpu.reciprocal %204 {approx = true} : vector<8x1xf32> -> vector<8x1xf32>
    %207 = vector.broadcast %206 : vector<8x1xf32> to vector<8x16xf32>
    %208 = arith.mulf %205, %207 : vector<8x16xf32>
    %cst_62 = arith.constant 0.000000e+00 : f32
    %209 = vector.broadcast %cst_62 : f32 to vector<8x16xf32>
    %210 = arith.cmpf ogt, %208, %209 : vector<8x16xf32>
    %cst_63 = arith.constant 0.000000e+00 : f32
    %211 = vector.broadcast %cst_63 : f32 to vector<8x16xf32>
    %212 = arith.minimumf %208, %211 : vector<8x16xf32>
    %213 = math.exp %212 : vector<8x16xf32>
    %cst_64 = arith.constant 1.000000e+00 : f32
    %214 = vector.broadcast %cst_64 : f32 to vector<8x16xf32>
    %215 = arith.subf %213, %214 : vector<8x16xf32>
    %216 = arith.select %210, %208, %215 : vector<8x16xi1>, vector<8x16xf32>
    %217 = vector.extract_strided_slice %4 {offsets = [0, 7], sizes = [8, 1], strides = [1, 1]} : vector<8x8xf32> to vector<8x1xf32>
    %218 = vector.extract_strided_slice %6 {offsets = [7, 0], sizes = [1, 8], strides = [1, 1]} : vector<8x8xf32> to vector<1x8xf32>
    %219 = vector.extract_strided_slice %2 {offsets = [0, 112], sizes = [8, 16], strides = [1, 1]} : vector<8x128xf32> to vector<8x16xf32>
    %220 = vector.broadcast %217 : vector<8x1xf32> to vector<8x8xf32>
    %221 = vector.broadcast %218 : vector<1x8xf32> to vector<8x8xf32>
    %222 = arith.addf %220, %221 : vector<8x8xf32>
    %cst_65 = arith.constant 0.000000e+00 : f32
    %223 = vector.broadcast %cst_65 : f32 to vector<8x8xf32>
    %224 = arith.cmpf ogt, %222, %223 : vector<8x8xf32>
    %cst_66 = arith.constant 2.000000e-01 : f32
    %225 = vector.broadcast %cst_66 : f32 to vector<8x8xf32>
    %226 = arith.mulf %225, %222 : vector<8x8xf32>
    %227 = arith.select %224, %222, %226 : vector<8x8xi1>, vector<8x8xf32>
    %cst_67 = arith.constant dense<0xFF800000> : vector<8xf32>
    %228 = vector.multi_reduction <maximumf>, %227, %cst_67 [1] : vector<8x8xf32> to vector<8xf32>
    %229 = vector.shape_cast %228 : vector<8xf32> to vector<8x1xf32>
    %230 = vector.broadcast %229 : vector<8x1xf32> to vector<8x8xf32>
    %231 = arith.subf %227, %230 : vector<8x8xf32>
    %232 = math.exp %231 : vector<8x8xf32>
    %cst_68 = arith.constant dense<0.000000e+00> : vector<8xf32>
    %233 = vector.multi_reduction <add>, %232, %cst_68 [1] : vector<8x8xf32> to vector<8xf32>
    %234 = vector.shape_cast %233 : vector<8xf32> to vector<8x1xf32>
    %cst_69 = arith.constant dense<0.000000e+00> : vector<8x16xf32>
    %235 = tpu.matmul %232, %219, %cst_69 {dimension_numbers = #tpu.dot_dimension_numbers<[1], [0], [0], [1], [0, 0, 1, 1], [], []>} : vector<8x8xf32>, vector<8x16xf32>, vector<8x16xf32> -> vector<8x16xf32>
    %236 = tpu.reciprocal %234 {approx = true} : vector<8x1xf32> -> vector<8x1xf32>
    %237 = vector.broadcast %236 : vector<8x1xf32> to vector<8x16xf32>
    %238 = arith.mulf %235, %237 : vector<8x16xf32>
    %cst_70 = arith.constant 0.000000e+00 : f32
    %239 = vector.broadcast %cst_70 : f32 to vector<8x16xf32>
    %240 = arith.cmpf ogt, %238, %239 : vector<8x16xf32>
    %cst_71 = arith.constant 0.000000e+00 : f32
    %241 = vector.broadcast %cst_71 : f32 to vector<8x16xf32>
    %242 = arith.minimumf %238, %241 : vector<8x16xf32>
    %243 = math.exp %242 : vector<8x16xf32>
    %cst_72 = arith.constant 1.000000e+00 : f32
    %244 = vector.broadcast %cst_72 : f32 to vector<8x16xf32>
    %245 = arith.subf %243, %244 : vector<8x16xf32>
    %246 = arith.select %240, %238, %245 : vector<8x16xi1>, vector<8x16xf32>
    %247 = tpu.concatenate %36, %66, %96, %126, %156, %186, %216, %246 in 1 : vector<8x16xf32>, vector<8x16xf32>, vector<8x16xf32>, vector<8x16xf32>, vector<8x16xf32>, vector<8x16xf32>, vector<8x16xf32>, vector<8x16xf32> -> vector<8x128xf32>
    %c0_73 = arith.constant 0 : index
    %c0_74 = arith.constant 0 : index
    %248 = vector.load %arg4[%c0_73, %c0_74] : memref<128x64xf32, #tpu.memory_space<vmem>>, vector<128x64xf32>
    %cst_75 = arith.constant dense<0.000000e+00> : vector<8x64xf32>
    %249 = tpu.matmul %247, %248, %cst_75 {dimension_numbers = #tpu.dot_dimension_numbers<[1], [0], [0], [1], [0, 0, 1, 1], [], []>} : vector<8x128xf32>, vector<128x64xf32>, vector<8x64xf32> -> vector<8x64xf32>
    %c0_76 = arith.constant 0 : index
    %c0_77 = arith.constant 0 : index
    %250 = vector.load %arg5[%c0_76, %c0_77] : memref<128x8xf32, #tpu.memory_space<vmem>>, vector<128x8xf32>
    %cst_78 = arith.constant dense<0.000000e+00> : vector<8x8xf32>
    %251 = tpu.matmul %247, %250, %cst_78 {dimension_numbers = #tpu.dot_dimension_numbers<[1], [0], [0], [1], [0, 0, 1, 1], [], []>} : vector<8x128xf32>, vector<128x8xf32>, vector<8x8xf32> -> vector<8x8xf32>
    %c0_79 = arith.constant 0 : index
    %c0_80 = arith.constant 0 : index
    %252 = vector.load %arg6[%c0_79, %c0_80] : memref<8x128xf32, #tpu.memory_space<vmem>>, vector<8x128xf32>
    %cst_81 = arith.constant dense<0.000000e+00> : vector<8x8xf32>
    %253 = tpu.matmul %252, %247, %cst_81 {dimension_numbers = #tpu.dot_dimension_numbers<[1], [1], [0], [0], [0, 0, 1, 0], [], []>} : vector<8x128xf32>, vector<8x128xf32>, vector<8x8xf32> -> vector<8x8xf32>
    %cst_82 = arith.constant 0.000000e+00 : f32
    %254 = vector.broadcast %cst_82 : f32 to vector<8x8xf32>
    %255 = vector.extract_strided_slice %251 {offsets = [0, 0], sizes = [8, 1], strides = [1, 1]} : vector<8x8xf32> to vector<8x1xf32>
    %256 = vector.extract_strided_slice %253 {offsets = [0, 0], sizes = [1, 8], strides = [1, 1]} : vector<8x8xf32> to vector<1x8xf32>
    %257 = vector.extract_strided_slice %249 {offsets = [0, 0], sizes = [8, 8], strides = [1, 1]} : vector<8x64xf32> to vector<8x8xf32>
    %258 = vector.broadcast %255 : vector<8x1xf32> to vector<8x8xf32>
    %259 = vector.broadcast %256 : vector<1x8xf32> to vector<8x8xf32>
    %260 = arith.addf %258, %259 : vector<8x8xf32>
    %cst_83 = arith.constant 0.000000e+00 : f32
    %261 = vector.broadcast %cst_83 : f32 to vector<8x8xf32>
    %262 = arith.cmpf ogt, %260, %261 : vector<8x8xf32>
    %cst_84 = arith.constant 2.000000e-01 : f32
    %263 = vector.broadcast %cst_84 : f32 to vector<8x8xf32>
    %264 = arith.mulf %263, %260 : vector<8x8xf32>
    %265 = arith.select %262, %260, %264 : vector<8x8xi1>, vector<8x8xf32>
    %cst_85 = arith.constant dense<0xFF800000> : vector<8xf32>
    %266 = vector.multi_reduction <maximumf>, %265, %cst_85 [1] : vector<8x8xf32> to vector<8xf32>
    %267 = vector.shape_cast %266 : vector<8xf32> to vector<8x1xf32>
    %268 = vector.broadcast %267 : vector<8x1xf32> to vector<8x8xf32>
    %269 = arith.subf %265, %268 : vector<8x8xf32>
    %270 = math.exp %269 : vector<8x8xf32>
    %cst_86 = arith.constant dense<0.000000e+00> : vector<8xf32>
    %271 = vector.multi_reduction <add>, %270, %cst_86 [1] : vector<8x8xf32> to vector<8xf32>
    %272 = vector.shape_cast %271 : vector<8xf32> to vector<8x1xf32>
    %cst_87 = arith.constant dense<0.000000e+00> : vector<8x8xf32>
    %273 = tpu.matmul %270, %257, %cst_87 {dimension_numbers = #tpu.dot_dimension_numbers<[1], [0], [0], [1], [0, 0, 1, 1], [], []>} : vector<8x8xf32>, vector<8x8xf32>, vector<8x8xf32> -> vector<8x8xf32>
    %274 = tpu.reciprocal %272 {approx = true} : vector<8x1xf32> -> vector<8x1xf32>
    %275 = vector.broadcast %274 : vector<8x1xf32> to vector<8x8xf32>
    %276 = arith.mulf %273, %275 : vector<8x8xf32>
    %277 = arith.addf %254, %276 : vector<8x8xf32>
    %278 = vector.extract_strided_slice %251 {offsets = [0, 1], sizes = [8, 1], strides = [1, 1]} : vector<8x8xf32> to vector<8x1xf32>
    %279 = vector.extract_strided_slice %253 {offsets = [1, 0], sizes = [1, 8], strides = [1, 1]} : vector<8x8xf32> to vector<1x8xf32>
    %280 = vector.extract_strided_slice %249 {offsets = [0, 8], sizes = [8, 8], strides = [1, 1]} : vector<8x64xf32> to vector<8x8xf32>
    %281 = vector.broadcast %278 : vector<8x1xf32> to vector<8x8xf32>
    %282 = vector.broadcast %279 : vector<1x8xf32> to vector<8x8xf32>
    %283 = arith.addf %281, %282 : vector<8x8xf32>
    %cst_88 = arith.constant 0.000000e+00 : f32
    %284 = vector.broadcast %cst_88 : f32 to vector<8x8xf32>
    %285 = arith.cmpf ogt, %283, %284 : vector<8x8xf32>
    %cst_89 = arith.constant 2.000000e-01 : f32
    %286 = vector.broadcast %cst_89 : f32 to vector<8x8xf32>
    %287 = arith.mulf %286, %283 : vector<8x8xf32>
    %288 = arith.select %285, %283, %287 : vector<8x8xi1>, vector<8x8xf32>
    %cst_90 = arith.constant dense<0xFF800000> : vector<8xf32>
    %289 = vector.multi_reduction <maximumf>, %288, %cst_90 [1] : vector<8x8xf32> to vector<8xf32>
    %290 = vector.shape_cast %289 : vector<8xf32> to vector<8x1xf32>
    %291 = vector.broadcast %290 : vector<8x1xf32> to vector<8x8xf32>
    %292 = arith.subf %288, %291 : vector<8x8xf32>
    %293 = math.exp %292 : vector<8x8xf32>
    %cst_91 = arith.constant dense<0.000000e+00> : vector<8xf32>
    %294 = vector.multi_reduction <add>, %293, %cst_91 [1] : vector<8x8xf32> to vector<8xf32>
    %295 = vector.shape_cast %294 : vector<8xf32> to vector<8x1xf32>
    %cst_92 = arith.constant dense<0.000000e+00> : vector<8x8xf32>
    %296 = tpu.matmul %293, %280, %cst_92 {dimension_numbers = #tpu.dot_dimension_numbers<[1], [0], [0], [1], [0, 0, 1, 1], [], []>} : vector<8x8xf32>, vector<8x8xf32>, vector<8x8xf32> -> vector<8x8xf32>
    %297 = tpu.reciprocal %295 {approx = true} : vector<8x1xf32> -> vector<8x1xf32>
    %298 = vector.broadcast %297 : vector<8x1xf32> to vector<8x8xf32>
    %299 = arith.mulf %296, %298 : vector<8x8xf32>
    %300 = arith.addf %277, %299 : vector<8x8xf32>
    %301 = vector.extract_strided_slice %251 {offsets = [0, 2], sizes = [8, 1], strides = [1, 1]} : vector<8x8xf32> to vector<8x1xf32>
    %302 = vector.extract_strided_slice %253 {offsets = [2, 0], sizes = [1, 8], strides = [1, 1]} : vector<8x8xf32> to vector<1x8xf32>
    %303 = vector.extract_strided_slice %249 {offsets = [0, 16], sizes = [8, 8], strides = [1, 1]} : vector<8x64xf32> to vector<8x8xf32>
    %304 = vector.broadcast %301 : vector<8x1xf32> to vector<8x8xf32>
    %305 = vector.broadcast %302 : vector<1x8xf32> to vector<8x8xf32>
    %306 = arith.addf %304, %305 : vector<8x8xf32>
    %cst_93 = arith.constant 0.000000e+00 : f32
    %307 = vector.broadcast %cst_93 : f32 to vector<8x8xf32>
    %308 = arith.cmpf ogt, %306, %307 : vector<8x8xf32>
    %cst_94 = arith.constant 2.000000e-01 : f32
    %309 = vector.broadcast %cst_94 : f32 to vector<8x8xf32>
    %310 = arith.mulf %309, %306 : vector<8x8xf32>
    %311 = arith.select %308, %306, %310 : vector<8x8xi1>, vector<8x8xf32>
    %cst_95 = arith.constant dense<0xFF800000> : vector<8xf32>
    %312 = vector.multi_reduction <maximumf>, %311, %cst_95 [1] : vector<8x8xf32> to vector<8xf32>
    %313 = vector.shape_cast %312 : vector<8xf32> to vector<8x1xf32>
    %314 = vector.broadcast %313 : vector<8x1xf32> to vector<8x8xf32>
    %315 = arith.subf %311, %314 : vector<8x8xf32>
    %316 = math.exp %315 : vector<8x8xf32>
    %cst_96 = arith.constant dense<0.000000e+00> : vector<8xf32>
    %317 = vector.multi_reduction <add>, %316, %cst_96 [1] : vector<8x8xf32> to vector<8xf32>
    %318 = vector.shape_cast %317 : vector<8xf32> to vector<8x1xf32>
    %cst_97 = arith.constant dense<0.000000e+00> : vector<8x8xf32>
    %319 = tpu.matmul %316, %303, %cst_97 {dimension_numbers = #tpu.dot_dimension_numbers<[1], [0], [0], [1], [0, 0, 1, 1], [], []>} : vector<8x8xf32>, vector<8x8xf32>, vector<8x8xf32> -> vector<8x8xf32>
    %320 = tpu.reciprocal %318 {approx = true} : vector<8x1xf32> -> vector<8x1xf32>
    %321 = vector.broadcast %320 : vector<8x1xf32> to vector<8x8xf32>
    %322 = arith.mulf %319, %321 : vector<8x8xf32>
    %323 = arith.addf %300, %322 : vector<8x8xf32>
    %324 = vector.extract_strided_slice %251 {offsets = [0, 3], sizes = [8, 1], strides = [1, 1]} : vector<8x8xf32> to vector<8x1xf32>
    %325 = vector.extract_strided_slice %253 {offsets = [3, 0], sizes = [1, 8], strides = [1, 1]} : vector<8x8xf32> to vector<1x8xf32>
    %326 = vector.extract_strided_slice %249 {offsets = [0, 24], sizes = [8, 8], strides = [1, 1]} : vector<8x64xf32> to vector<8x8xf32>
    %327 = vector.broadcast %324 : vector<8x1xf32> to vector<8x8xf32>
    %328 = vector.broadcast %325 : vector<1x8xf32> to vector<8x8xf32>
    %329 = arith.addf %327, %328 : vector<8x8xf32>
    %cst_98 = arith.constant 0.000000e+00 : f32
    %330 = vector.broadcast %cst_98 : f32 to vector<8x8xf32>
    %331 = arith.cmpf ogt, %329, %330 : vector<8x8xf32>
    %cst_99 = arith.constant 2.000000e-01 : f32
    %332 = vector.broadcast %cst_99 : f32 to vector<8x8xf32>
    %333 = arith.mulf %332, %329 : vector<8x8xf32>
    %334 = arith.select %331, %329, %333 : vector<8x8xi1>, vector<8x8xf32>
    %cst_100 = arith.constant dense<0xFF800000> : vector<8xf32>
    %335 = vector.multi_reduction <maximumf>, %334, %cst_100 [1] : vector<8x8xf32> to vector<8xf32>
    %336 = vector.shape_cast %335 : vector<8xf32> to vector<8x1xf32>
    %337 = vector.broadcast %336 : vector<8x1xf32> to vector<8x8xf32>
    %338 = arith.subf %334, %337 : vector<8x8xf32>
    %339 = math.exp %338 : vector<8x8xf32>
    %cst_101 = arith.constant dense<0.000000e+00> : vector<8xf32>
    %340 = vector.multi_reduction <add>, %339, %cst_101 [1] : vector<8x8xf32> to vector<8xf32>
    %341 = vector.shape_cast %340 : vector<8xf32> to vector<8x1xf32>
    %cst_102 = arith.constant dense<0.000000e+00> : vector<8x8xf32>
    %342 = tpu.matmul %339, %326, %cst_102 {dimension_numbers = #tpu.dot_dimension_numbers<[1], [0], [0], [1], [0, 0, 1, 1], [], []>} : vector<8x8xf32>, vector<8x8xf32>, vector<8x8xf32> -> vector<8x8xf32>
    %343 = tpu.reciprocal %341 {approx = true} : vector<8x1xf32> -> vector<8x1xf32>
    %344 = vector.broadcast %343 : vector<8x1xf32> to vector<8x8xf32>
    %345 = arith.mulf %342, %344 : vector<8x8xf32>
    %346 = arith.addf %323, %345 : vector<8x8xf32>
    %347 = vector.extract_strided_slice %251 {offsets = [0, 4], sizes = [8, 1], strides = [1, 1]} : vector<8x8xf32> to vector<8x1xf32>
    %348 = vector.extract_strided_slice %253 {offsets = [4, 0], sizes = [1, 8], strides = [1, 1]} : vector<8x8xf32> to vector<1x8xf32>
    %349 = vector.extract_strided_slice %249 {offsets = [0, 32], sizes = [8, 8], strides = [1, 1]} : vector<8x64xf32> to vector<8x8xf32>
    %350 = vector.broadcast %347 : vector<8x1xf32> to vector<8x8xf32>
    %351 = vector.broadcast %348 : vector<1x8xf32> to vector<8x8xf32>
    %352 = arith.addf %350, %351 : vector<8x8xf32>
    %cst_103 = arith.constant 0.000000e+00 : f32
    %353 = vector.broadcast %cst_103 : f32 to vector<8x8xf32>
    %354 = arith.cmpf ogt, %352, %353 : vector<8x8xf32>
    %cst_104 = arith.constant 2.000000e-01 : f32
    %355 = vector.broadcast %cst_104 : f32 to vector<8x8xf32>
    %356 = arith.mulf %355, %352 : vector<8x8xf32>
    %357 = arith.select %354, %352, %356 : vector<8x8xi1>, vector<8x8xf32>
    %cst_105 = arith.constant dense<0xFF800000> : vector<8xf32>
    %358 = vector.multi_reduction <maximumf>, %357, %cst_105 [1] : vector<8x8xf32> to vector<8xf32>
    %359 = vector.shape_cast %358 : vector<8xf32> to vector<8x1xf32>
    %360 = vector.broadcast %359 : vector<8x1xf32> to vector<8x8xf32>
    %361 = arith.subf %357, %360 : vector<8x8xf32>
    %362 = math.exp %361 : vector<8x8xf32>
    %cst_106 = arith.constant dense<0.000000e+00> : vector<8xf32>
    %363 = vector.multi_reduction <add>, %362, %cst_106 [1] : vector<8x8xf32> to vector<8xf32>
    %364 = vector.shape_cast %363 : vector<8xf32> to vector<8x1xf32>
    %cst_107 = arith.constant dense<0.000000e+00> : vector<8x8xf32>
    %365 = tpu.matmul %362, %349, %cst_107 {dimension_numbers = #tpu.dot_dimension_numbers<[1], [0], [0], [1], [0, 0, 1, 1], [], []>} : vector<8x8xf32>, vector<8x8xf32>, vector<8x8xf32> -> vector<8x8xf32>
    %366 = tpu.reciprocal %364 {approx = true} : vector<8x1xf32> -> vector<8x1xf32>
    %367 = vector.broadcast %366 : vector<8x1xf32> to vector<8x8xf32>
    %368 = arith.mulf %365, %367 : vector<8x8xf32>
    %369 = arith.addf %346, %368 : vector<8x8xf32>
    %370 = vector.extract_strided_slice %251 {offsets = [0, 5], sizes = [8, 1], strides = [1, 1]} : vector<8x8xf32> to vector<8x1xf32>
    %371 = vector.extract_strided_slice %253 {offsets = [5, 0], sizes = [1, 8], strides = [1, 1]} : vector<8x8xf32> to vector<1x8xf32>
    %372 = vector.extract_strided_slice %249 {offsets = [0, 40], sizes = [8, 8], strides = [1, 1]} : vector<8x64xf32> to vector<8x8xf32>
    %373 = vector.broadcast %370 : vector<8x1xf32> to vector<8x8xf32>
    %374 = vector.broadcast %371 : vector<1x8xf32> to vector<8x8xf32>
    %375 = arith.addf %373, %374 : vector<8x8xf32>
    %cst_108 = arith.constant 0.000000e+00 : f32
    %376 = vector.broadcast %cst_108 : f32 to vector<8x8xf32>
    %377 = arith.cmpf ogt, %375, %376 : vector<8x8xf32>
    %cst_109 = arith.constant 2.000000e-01 : f32
    %378 = vector.broadcast %cst_109 : f32 to vector<8x8xf32>
    %379 = arith.mulf %378, %375 : vector<8x8xf32>
    %380 = arith.select %377, %375, %379 : vector<8x8xi1>, vector<8x8xf32>
    %cst_110 = arith.constant dense<0xFF800000> : vector<8xf32>
    %381 = vector.multi_reduction <maximumf>, %380, %cst_110 [1] : vector<8x8xf32> to vector<8xf32>
    %382 = vector.shape_cast %381 : vector<8xf32> to vector<8x1xf32>
    %383 = vector.broadcast %382 : vector<8x1xf32> to vector<8x8xf32>
    %384 = arith.subf %380, %383 : vector<8x8xf32>
    %385 = math.exp %384 : vector<8x8xf32>
    %cst_111 = arith.constant dense<0.000000e+00> : vector<8xf32>
    %386 = vector.multi_reduction <add>, %385, %cst_111 [1] : vector<8x8xf32> to vector<8xf32>
    %387 = vector.shape_cast %386 : vector<8xf32> to vector<8x1xf32>
    %cst_112 = arith.constant dense<0.000000e+00> : vector<8x8xf32>
    %388 = tpu.matmul %385, %372, %cst_112 {dimension_numbers = #tpu.dot_dimension_numbers<[1], [0], [0], [1], [0, 0, 1, 1], [], []>} : vector<8x8xf32>, vector<8x8xf32>, vector<8x8xf32> -> vector<8x8xf32>
    %389 = tpu.reciprocal %387 {approx = true} : vector<8x1xf32> -> vector<8x1xf32>
    %390 = vector.broadcast %389 : vector<8x1xf32> to vector<8x8xf32>
    %391 = arith.mulf %388, %390 : vector<8x8xf32>
    %392 = arith.addf %369, %391 : vector<8x8xf32>
    %393 = vector.extract_strided_slice %251 {offsets = [0, 6], sizes = [8, 1], strides = [1, 1]} : vector<8x8xf32> to vector<8x1xf32>
    %394 = vector.extract_strided_slice %253 {offsets = [6, 0], sizes = [1, 8], strides = [1, 1]} : vector<8x8xf32> to vector<1x8xf32>
    %395 = vector.extract_strided_slice %249 {offsets = [0, 48], sizes = [8, 8], strides = [1, 1]} : vector<8x64xf32> to vector<8x8xf32>
    %396 = vector.broadcast %393 : vector<8x1xf32> to vector<8x8xf32>
    %397 = vector.broadcast %394 : vector<1x8xf32> to vector<8x8xf32>
    %398 = arith.addf %396, %397 : vector<8x8xf32>
    %cst_113 = arith.constant 0.000000e+00 : f32
    %399 = vector.broadcast %cst_113 : f32 to vector<8x8xf32>
    %400 = arith.cmpf ogt, %398, %399 : vector<8x8xf32>
    %cst_114 = arith.constant 2.000000e-01 : f32
    %401 = vector.broadcast %cst_114 : f32 to vector<8x8xf32>
    %402 = arith.mulf %401, %398 : vector<8x8xf32>
    %403 = arith.select %400, %398, %402 : vector<8x8xi1>, vector<8x8xf32>
    %cst_115 = arith.constant dense<0xFF800000> : vector<8xf32>
    %404 = vector.multi_reduction <maximumf>, %403, %cst_115 [1] : vector<8x8xf32> to vector<8xf32>
    %405 = vector.shape_cast %404 : vector<8xf32> to vector<8x1xf32>
    %406 = vector.broadcast %405 : vector<8x1xf32> to vector<8x8xf32>
    %407 = arith.subf %403, %406 : vector<8x8xf32>
    %408 = math.exp %407 : vector<8x8xf32>
    %cst_116 = arith.constant dense<0.000000e+00> : vector<8xf32>
    %409 = vector.multi_reduction <add>, %408, %cst_116 [1] : vector<8x8xf32> to vector<8xf32>
    %410 = vector.shape_cast %409 : vector<8xf32> to vector<8x1xf32>
    %cst_117 = arith.constant dense<0.000000e+00> : vector<8x8xf32>
    %411 = tpu.matmul %408, %395, %cst_117 {dimension_numbers = #tpu.dot_dimension_numbers<[1], [0], [0], [1], [0, 0, 1, 1], [], []>} : vector<8x8xf32>, vector<8x8xf32>, vector<8x8xf32> -> vector<8x8xf32>
    %412 = tpu.reciprocal %410 {approx = true} : vector<8x1xf32> -> vector<8x1xf32>
    %413 = vector.broadcast %412 : vector<8x1xf32> to vector<8x8xf32>
    %414 = arith.mulf %411, %413 : vector<8x8xf32>
    %415 = arith.addf %392, %414 : vector<8x8xf32>
    %416 = vector.extract_strided_slice %251 {offsets = [0, 7], sizes = [8, 1], strides = [1, 1]} : vector<8x8xf32> to vector<8x1xf32>
    %417 = vector.extract_strided_slice %253 {offsets = [7, 0], sizes = [1, 8], strides = [1, 1]} : vector<8x8xf32> to vector<1x8xf32>
    %418 = vector.extract_strided_slice %249 {offsets = [0, 56], sizes = [8, 8], strides = [1, 1]} : vector<8x64xf32> to vector<8x8xf32>
    %419 = vector.broadcast %416 : vector<8x1xf32> to vector<8x8xf32>
    %420 = vector.broadcast %417 : vector<1x8xf32> to vector<8x8xf32>
    %421 = arith.addf %419, %420 : vector<8x8xf32>
    %cst_118 = arith.constant 0.000000e+00 : f32
    %422 = vector.broadcast %cst_118 : f32 to vector<8x8xf32>
    %423 = arith.cmpf ogt, %421, %422 : vector<8x8xf32>
    %cst_119 = arith.constant 2.000000e-01 : f32
    %424 = vector.broadcast %cst_119 : f32 to vector<8x8xf32>
    %425 = arith.mulf %424, %421 : vector<8x8xf32>
    %426 = arith.select %423, %421, %425 : vector<8x8xi1>, vector<8x8xf32>
    %cst_120 = arith.constant dense<0xFF800000> : vector<8xf32>
    %427 = vector.multi_reduction <maximumf>, %426, %cst_120 [1] : vector<8x8xf32> to vector<8xf32>
    %428 = vector.shape_cast %427 : vector<8xf32> to vector<8x1xf32>
    %429 = vector.broadcast %428 : vector<8x1xf32> to vector<8x8xf32>
    %430 = arith.subf %426, %429 : vector<8x8xf32>
    %431 = math.exp %430 : vector<8x8xf32>
    %cst_121 = arith.constant dense<0.000000e+00> : vector<8xf32>
    %432 = vector.multi_reduction <add>, %431, %cst_121 [1] : vector<8x8xf32> to vector<8xf32>
    %433 = vector.shape_cast %432 : vector<8xf32> to vector<8x1xf32>
    %cst_122 = arith.constant dense<0.000000e+00> : vector<8x8xf32>
    %434 = tpu.matmul %431, %418, %cst_122 {dimension_numbers = #tpu.dot_dimension_numbers<[1], [0], [0], [1], [0, 0, 1, 1], [], []>} : vector<8x8xf32>, vector<8x8xf32>, vector<8x8xf32> -> vector<8x8xf32>
    %435 = tpu.reciprocal %433 {approx = true} : vector<8x1xf32> -> vector<8x1xf32>
    %436 = vector.broadcast %435 : vector<8x1xf32> to vector<8x8xf32>
    %437 = arith.mulf %434, %436 : vector<8x8xf32>
    %438 = arith.addf %415, %437 : vector<8x8xf32>
    %cst_123 = arith.constant 1.250000e-01 : f32
    %439 = vector.broadcast %cst_123 : f32 to vector<8x8xf32>
    %440 = arith.mulf %438, %439 : vector<8x8xf32>
    %c0_124 = arith.constant 0 : index
    %c0_125 = arith.constant 0 : index
    %441 = vector.load %arg7[%c0_124, %c0_125] : memref<8x8xf32, #tpu.memory_space<vmem>>, vector<8x8xf32>
    tpu.vector_store %arg7[%c0_124, %c0_125], %440 {strides = array<i32>} : memref<8x8xf32, #tpu.memory_space<vmem>>, vector<8x8xf32>,
    return
  }
}

</mosaic_0001>

<bundles_post_ra>
// kernel: categorical_topk_gat_forward.1
= control target key start
LH: loop header
LB: loop body
LE: loop exit
PB: predicated region body
PF: predicated region fallthrough
CT: control target
= control target key end

     0   :  { %v2665_v2 = vmov 0.0|0.0   ;;  %vm2666_vm0 = vmmov 0   ;;  %v2667_v4 = vmov 0.0   ;;  %s3152_s0 = inlined_call_operand.vmem [shape: f32[8,16], index: 0, kind: input, shape index: {}]   ;;  %s3153_s1 = inlined_call_operand.vmem [shape: f32[16,128], index: 1, kind: input, shape index: {}]   ;;  %s3154_s2 = inlined_call_operand.vmem [shape: f32[16,8], index: 2, kind: input, shape index: {}]   ;;  %s3155_s3 = inlined_call_operand.vmem [shape: f32[8,16], index: 3, kind: input, shape index: {}]   ;;  %s3156_s4 = inlined_call_operand.vmem [shape: f32[128,64], index: 4, kind: input, shape index: {}]   ;;  %s3157_s5 = inlined_call_operand.vmem [shape: f32[128,8], index: 5, kind: input, shape index: {}]   ;;  %s3158_s6 = inlined_call_operand.vmem [shape: f32[8,128], index: 6, kind: input, shape index: {}]   ;;  %s3159_s7 = inlined_call_operand.hbm [shape: f32[8,8], index: 7, kind: output, shape index: {}]  }
   0x1   :  { %v104_v0 = vld [vmem:[%s3154_s2] sm:$0xff]  ;;  %v105_v1 = vld [vmem:[%s3154_s2 + $0x8] sm:$0xff]  ;;  %2470 = vmatprep.subr.bf16.mxu1 %v2665_v2  ;;  %2304 = vmatprep.mubr.msk.f32.mxu1 %vm2666_vm0, %v2667_v4 }
   0x2   :  { %v2471_v3 = vpack.c.bf16 %v105_v1, %v104_v0  ;;  %v28_v5 = vld [vmem:[%s3153_s1] sm:$0xff]  ;;  %v29_v6 = vld [vmem:[%s3153_s1 + $0x8] sm:$0xff]  ;;  %2467 = vmatprep.subr.bf16.mxu0 %v2665_v2  ;;  %2297 = vmatprep.mubr.msk.f32.mxu0 %vm2666_vm0, %v2667_v4 }
   0x3   :  { %v2468_v7 = vpack.c.bf16 %v29_v6, %v28_v5 }
   0x4   :  { %12 = vsyncpa [#allocation3], 0  ;;  %2472 = vmatpush3.bf16.msra.mxu1 %v2471_v3  ;;  %v27_v8 = vld [vmem:[%s3152_s0] sm:$0xff]  ;;  %vm30_vm1 = vcmask 130048   ;;  %v2668_v9 = vmov 2   ;;  %v2669_v10 = vmov 0   ;;  %v255_v24 = vlaneseq }
   0x5   :  { %2546 = vset.pattern.permute.xlu1 %v2668_v9  ;;  %2469 = vmatpush3.bf16.msra.mxu0 %v2468_v7  ;;  %v176_v11 = vld [vmem:[%s3155_s3] sm:$0xff]  ;;  %v2670_v16 = vmov 3   ;;  %v2671_v17 = vmov 1   ;;  %v2672_v18 = vmov 4   ;;  %v2673_v19 = vmov 5   ;;  %s2675_s3 = smov 96  }
   0x6   :  { %2544 = vset.pattern.permute.xlu0 %v2669_v10  ;;  %2307 = vmatprep.subr.mxu0 %v2667_v4  ;;  %v2674_v22 = vmov 6   ;;  %s2676_s10 = smov 48   ;;  %v2677_v23 = vmov 7   ;;  %s2678_s11 = smov 112   ;;  %v2787_v25 = vshrl.u32 %v255_v24, 7  ;;  %vm263_vm3 = vcmask 64512  }
   0x7   :  { %2312 = vmatprep.subr.mxu1 %v2667_v4  ;;  %2305 = vmatmul.mubr.msk.f32.vlgmr.msra.gmra.mrb[0].mxu1 %vm30_vm1, %v27_v8  ;;  %s2679_s12 = smov 80   ;;  %s2680_s13 = smov 64  }
   0x8   :  { %2298 = vmatmul.mubr.msk.f32.vlgmr.msra.gmra.mrb[0].mxu0 %vm30_vm1, %v27_v8  ;;  %2314 = vmatprep.mubr.msk.f32.mxu1 %vm2666_vm0, %v2667_v4  ;;  %v466_v26 = vsub.s32 2, %v2787_v25  ;;  %v257_v27 = vsub.s32 0, %v2787_v25  ;;  %v571_v30 = vsub.s32 3, %v2787_v25  ;;  %v360_v31 = vsub.s32 1, %v2787_v25  ;;  %s2681_s14 = smov 32   ;;  %s2682_s15 = smov 16  }
   0x9   :  { %2309 = vmatprep.mubr.msk.f32.mxu0 %vm2666_vm0, %v2667_v4  ;;  %v676_v43 = vsub.s32 4, %v2787_v25  ;;  %v781_v44 = vsub.s32 5, %v2787_v25  ;;  %v886_v57 = vsub.s32 6, %v2787_v25  ;;  %v991_v7 = vsub.s32 7, %v2787_v25 }
   0xe   :  { %2308 = vmatpush3.xpose.msk.msra.mxu0 %vm30_vm1, %v27_v8 }
   0xf   :  { %2317 = vmatprep.subr.mxu0 %v2667_v4 }
  0x11   :  { %2310 = vmatmul.mubr.msk.f32.vlgmr.msra.gmra.mrb[2].mxu0 %vm30_vm1, %v176_v11 }
  0x12   :  { %2319 = vmatprep.mubr.msk.f32.mxu0 %vm2666_vm0, %v2667_v4 }
  0xda   :  { %v172_v12 = vpop.f32.mrb[0].mxu1 }
  0xdb   :  { %461 = vperm.xlu1 %2546, %v172_v12   ;;  %252 = vperm.xlu0 %2544, %v172_v12   ;;  %v2306_v13 = vpop.f32.mrb[1].mxu1  ;;  %v2766_v14 = vpop.f32.mrb[0].mxu0 }
  0xdc   :  { %v2299_v15 = vpop.f32.mrb[1].mxu0  ;;  %2313 = vmatpush3.msra.mxu1 %v2766_v14 }
  0xdd   :  { %2322 = vmatprep.subr.mxu1 %v2667_v4 }
  0xdf   :  { %2547 = vset.pattern.permute.xlu1 %v2670_v16  ;;  %2545 = vset.pattern.permute.xlu0 %v2671_v17 }
  0xe0   :  { %566 = vperm.xlu1 %2547, %v172_v12   ;;  %355 = vperm.xlu0 %2545, %v172_v12  }
  0xe4   :  { %2548 = vset.pattern.permute.xlu1 %v2672_v18  ;;  %2549 = vset.pattern.permute.xlu0 %v2673_v19  ;;  %v2773_v20 = vpop.f32.mrb[2].mxu0 }
  0xe5   :  { %671 = vperm.xlu1 %2548, %v172_v12   ;;  %776 = vperm.xlu0 %2549, %v172_v12   ;;  %v2311_v21 = vpop.f32.mrb[3].mxu0  ;;  %v467_v28 = vrot.slane %v2773_v20, %v466_v26  ;;  %v258_v29 = vrot.slane %v2773_v20, %v257_v27  ;;  %v572_v36 = vrot.slane %v2773_v20, %v571_v30 }
  0xe6   :  { %v361_v37 = vrot.slane %v2773_v20, %v360_v31  ;;  %v677_v51 = vrot.slane %v2773_v20, %v676_v43  ;;  %v782_v52 = vrot.slane %v2773_v20, %v781_v44  ;;  %v887_v0 = vrot.slane %v2773_v20, %v886_v57 }
  0xe7   :  { %v992_v13 = vrot.slane %v2773_v20, %v991_v7 }
  0xe9   :  { %2550 = vset.pattern.permute.xlu1 %v2674_v22  ;;  %481 = vrot.lane.b32.xlu0 %v2766_v14, %s2675_s3 }
  0xea   :  { %881 = vperm.xlu1 %2550, %v172_v12   ;;  %2552 = vset.pattern.permute.xlu0 %v2669_v10 }
  0xed   :  { %796 = vrot.lane.b32.xlu0 %v2766_v14, %s2676_s10 }
  0xee   :  { %2551 = vset.pattern.permute.xlu1 %v2677_v23 }
  0xef   :  { %986 = vperm.xlu1 %2551, %v172_v12  }
  0xf3   :  { %376 = vrot.lane.b32.xlu1 %v2766_v14, %s2678_s11 }
  0xf4   :  { %2553 = vset.pattern.permute.xlu1 %v2671_v17 }
  0xf7   :  { %586 = vrot.lane.b32.xlu1 %v2766_v14, %s2679_s12 }
  0xfb   :  { %691 = vrot.lane.b32.xlu1 %v2766_v14, %s2680_s13 }
 0x15a   :  { %v462_v32 = vpop.permute.xlu1 %461  ;;  %v253_v33 = vpop.permute.xlu0 %252 }
 0x15b   :  { %v468_v34 = vadd.f32 %v467_v28, %v462_v32  ;;  %v259_v35 = vadd.f32 %v258_v29, %v253_v33 }
 0x15d   :  { %v470_v38 = vmul.f32 0.2, %v468_v34  ;;  %v261_v39 = vmul.f32 0.2, %v259_v35  ;;  %vm260_vm2 = vcmp.gt.f32.partialorder %v259_v35, 0.0  ;;  %vm469_vm4 = vcmp.gt.f32.partialorder %v468_v34, 0.0 }
 0x15f   :  { %v567_v40 = vpop.permute.xlu1 %566  ;;  %v356_v41 = vpop.permute.xlu0 %355  ;;  %v2805_v42 = vsel %vm260_vm2, %v259_v35, %v261_v39  ;;  %v2811_v48 = vsel %vm469_vm4, %v468_v34, %v470_v38 }
 0x160   :  { %v573_v45 = vadd.f32 %v572_v36, %v567_v40  ;;  %v362_v46 = vadd.f32 %v361_v37, %v356_v41  ;;  %v264_v47 = vsel %vm263_vm3, %v2805_v42, -inf  ;;  %v472_v55 = vsel %vm263_vm3, %v2811_v48, -inf }
 0x161   :  { %265 = vmax.xlane.f32.xlu0 %v264_v47 }
 0x162   :  { %v575_v49 = vmul.f32 0.2, %v573_v45  ;;  %v364_v50 = vmul.f32 0.2, %v362_v46  ;;  %vm363_vm5 = vcmp.gt.f32.partialorder %v362_v46, 0.0  ;;  %vm574_vm6 = vcmp.gt.f32.partialorder %v573_v45, 0.0 }
 0x164   :  { %v672_v53 = vpop.permute.xlu1 %671  ;;  %v777_v54 = vpop.permute.xlu0 %776  ;;  %v365_v56 = vsel %vm363_vm5, %v362_v46, %v364_v50  ;;  %v576_v61 = vsel %vm574_vm6, %v573_v45, %v575_v49  ;;  %vm1119_vm6 = vcmask 261120  }
 0x165   :  { %v678_v58 = vadd.f32 %v677_v51, %v672_v53  ;;  %v783_v59 = vadd.f32 %v782_v52, %v777_v54  ;;  %473 = vmax.xlane.f32.xlu0 %v472_v55  ;;  %v366_v60 = vsel %vm263_vm3, %v365_v56, -inf  ;;  %v577_v1 = vsel %vm263_vm3, %v576_v61, -inf }
 0x166   :  { %367 = vmax.xlane.f32.xlu1 %v366_v60 }
 0x167   :  { %v680_v62 = vmul.f32 0.2, %v678_v58  ;;  %v785_v63 = vmul.f32 0.2, %v783_v59  ;;  %vm679_vm7 = vcmp.gt.f32.partialorder %v678_v58, 0.0  ;;  %vm784_vm8 = vcmp.gt.f32.partialorder %v783_v59, 0.0 }
 0x168   :  { %v482_v20 = vpop.permute.xlu0 %481 }
 0x169   :  { %v882_v3 = vpop.permute.xlu1 %881  ;;  %578 = vmax.xlane.f32.xlu0 %v577_v1  ;;  %v681_v5 = vsel %vm679_vm7, %v678_v58, %v680_v62  ;;  %v786_v6 = vsel %vm784_vm8, %v783_v59, %v785_v63  ;;  %vm1121_vm7 = vcmask 392192   ;;  %vm1123_vm8 = vcmask 523264  }
 0x16a   :  { %v888_v8 = vadd.f32 %v887_v0, %v882_v3  ;;  %v682_v10 = vsel %vm263_vm3, %v681_v5, -inf  ;;  %v787_v12 = vsel %vm263_vm3, %v786_v6, -inf }
 0x16b   :  { %683 = vmax.xlane.f32.xlu1 %v682_v10 }
 0x16c   :  { %v890_v11 = vmul.f32 0.2, %v888_v8  ;;  %vm889_vm9 = vcmp.gt.f32.partialorder %v888_v8, 0.0  ;;  %v797_v35 = vpop.permute.xlu0 %796 }
 0x16d   :  { %788 = vmax.xlane.f32.xlu0 %v787_v12 }
 0x16e   :  { %v987_v15 = vpop.permute.xlu1 %986  ;;  %v891_v17 = vsel %vm889_vm9, %v888_v8, %v890_v11  ;;  %vm1125_vm9 = vcmask 654336  }
 0x16f   :  { %v993_v21 = vadd.f32 %v992_v13, %v987_v15  ;;  %v892_v24 = vsel %vm263_vm3, %v891_v17, -inf }
 0x170   :  { %893 = vmax.xlane.f32.xlu1 %v892_v24 }
 0x171   :  { %v995_v28 = vmul.f32 0.2, %v993_v21  ;;  %vm994_vm10 = vcmp.gt.f32.partialorder %v993_v21, 0.0 }
 0x172   :  { %v377_v29 = vpop.permute.xlu1 %376 }
 0x173   :  { %v996_v32 = vsel %vm994_vm10, %v993_v21, %v995_v28  ;;  %2318 = vmatpush3.msra.mxu0 %v377_v29  ;;  %vm1127_vm10 = vcmask 785408  }
 0x174   :  { %v997_v33 = vsel %vm263_vm3, %v996_v32, -inf  ;;  %2327 = vmatprep.subr.mxu0 %v2667_v4 }
 0x175   :  { %998 = vmax.xlane.f32.xlu0 %v997_v33  ;;  %v1131_v33 = vld [vmem:[%s3156_s4] sm:$0xff] }
 0x176   :  { %v587_v34 = vpop.permute.xlu1 %586 }
 0x17a   :  { %v692_v37 = vpop.permute.xlu1 %691 }
 0x181   :  { %901 = vrot.lane.b32.xlu1 %v2766_v14, %s2681_s14 }
 0x18b   :  { %1006 = vrot.lane.b32.xlu0 %v2766_v14, %s2682_s15 }
 0x1ee   :  { %v266_v36 = vpop.xlane.xlu0 %265 }
 0x1ef   :  { %v267_v38 = vsub.f32 %v2805_v42, %v266_v36  ;;  %v1134_v36 = vld [vmem:[%s3156_s4 + $0x18] sm:$0xff] }
 0x1f1   :  { %v268_v39 = vmul.f32 1.442695, %v267_v38  ;;  %v1218_v38 = vld [vmem:[%s3157_s5 + $0x8] sm:$0xff] }
 0x1f2   :  { %v474_v40 = vpop.xlane.xlu0 %473 }
 0x1f3   :  { %2561 = vpow2.f32 %v268_v39  ;;  %v475_v41 = vsub.f32 %v2811_v48, %v474_v40  ;;  %v368_v45 = vpop.xlane.xlu1 %367  ;;  %v1219_v40 = vld [vmem:[%s3157_s5 + $0x10] sm:$0xff] }
 0x1f4   :  { %v369_v46 = vsub.f32 %v365_v56, %v368_v45  ;;  %v1220_v45 = vld [vmem:[%s3157_s5 + $0x18] sm:$0xff] }
 0x1f5   :  { %v476_v47 = vmul.f32 1.442695, %v475_v41 }
 0x1f6   :  { %v370_v49 = vmul.f32 1.442695, %v369_v46  ;;  %v579_v50 = vpop.xlane.xlu0 %578  ;;  %v1135_v46 = vld [vmem:[%s3156_s4 + $0x20] sm:$0xff] }
 0x1f7   :  { %2563 = vpow2.f32 %v476_v47  ;;  %v580_v51 = vsub.f32 %v576_v61, %v579_v50  ;;  %v1136_v47 = vld [vmem:[%s3156_s4 + $0x28] sm:$0xff]  ;;  %v1221_v50 = vld [vmem:[%s3157_s5 + $0x20] sm:$0xff] }
 0x1f8   :  { %2565 = vpow2.f32 %v370_v49  ;;  %v684_v14 = vpop.xlane.xlu1 %683  ;;  %v2501_v49 = vpack.c.bf16 %v1220_v45, %v1219_v40  ;;  %v1142_v40 = vld [vmem:[%s3156_s4 + $0x58] sm:$0xff] }
 0x1f9   :  { %v581_v52 = vmul.f32 1.442695, %v580_v51  ;;  %v685_v53 = vsub.f32 %v681_v5, %v684_v14  ;;  %v1222_v51 = vld [vmem:[%s3157_s5 + $0x28] sm:$0xff]  ;;  %v2480_v14 = vpack.c.bf16 %v1136_v47, %v1135_v46 }
 0x1fa   :  { %v789_v54 = vpop.xlane.xlu0 %788 }
 0x1fb   :  { %2567 = vpow2.f32 %v581_v52  ;;  %v686_v55 = vmul.f32 1.442695, %v685_v53  ;;  %v790_v42 = vsub.f32 %v786_v6, %v789_v54  ;;  %v1137_v52 = vld [vmem:[%s3156_s4 + $0x30] sm:$0xff]  ;;  %v1138_v53 = vld [vmem:[%s3156_s4 + $0x38] sm:$0xff]  ;;  %v2504_v54 = vpack.c.bf16 %v1222_v51, %v1221_v50  ;;  %v1225_v51 = vld [vmem:[%s3157_s5 + $0x40] sm:$0xff] }
 0x1fd   :  { %v2562_v58 = vpop.eup %2561  ;;  %2569 = vpow2.f32 %v686_v55  ;;  %v791_v59 = vmul.f32 1.442695, %v790_v42  ;;  %v894_v60 = vpop.xlane.xlu1 %893  ;;  %v1223_v55 = vld [vmem:[%s3157_s5 + $0x30] sm:$0xff]  ;;  %v1224_v42 = vld [vmem:[%s3157_s5 + $0x38] sm:$0xff] }
 0x1fe   :  { %v895_v48 = vsub.f32 %v891_v17, %v894_v60  ;;  %2315 = vmatmul.mubr.msk.f32.vlgmr.msra.gmra.mrb[2].mxu1 %vm263_vm3, %v2562_v58  ;;  %v270_v29 = vsel %vm263_vm3, %v2562_v58, 0.0  ;;  %v2483_v58 = vpack.c.bf16 %v1138_v53, %v1137_v52  ;;  %v1140_v60 = vld [vmem:[%s3156_s4 + $0x48] sm:$0xff]  ;;  %v1143_v52 = vld [vmem:[%s3156_s4 + $0x60] sm:$0xff] }
 0x1ff   :  { %2571 = vpow2.f32 %v791_v59  ;;  %2323 = vmatpush3.msra.mxu1 %v482_v20  ;;  %2324 = vmatprep.mubr.msk.f32.mxu1 %vm2666_vm0, %v2667_v4  ;;  %v1132_v20 = vld [vmem:[%s3156_s4 + $0x8] sm:$0xff]  ;;  %v1139_v59 = vld [vmem:[%s3156_s4 + $0x40] sm:$0xff] }
 0x200   :  { %v896_v56 = vmul.f32 1.442695, %v895_v48  ;;  %2332 = vmatprep.subr.mxu1 %v2667_v4  ;;  %v2507_v48 = vpack.c.bf16 %v1224_v42, %v1223_v55 }
 0x201   :  { %v2564_v61 = vpop.eup %2563  ;;  %v902_v13 = vpop.permute.xlu1 %901 }
 0x202   :  { %v2566_v62 = vpop.eup %2565  ;;  %2573 = vpow2.f32 %v896_v56  ;;  %2325 = vmatmul.mubr.msk.f32.vlgmr.msra.gmra.mrb[4].mxu1 %vm263_vm3, %v2564_v61  ;;  %v999_v63 = vpop.xlane.xlu0 %998  ;;  %v478_v0 = vsel %vm263_vm3, %v2564_v61, 0.0  ;;  %v2486_v56 = vpack.c.bf16 %v1140_v60, %v1139_v59 }
 0x203   :  { %2333 = vmatpush3.msra.mxu1 %v692_v37  ;;  %v1000_v1 = vsub.f32 %v996_v32, %v999_v63  ;;  %2320 = vmatmul.mubr.msk.f32.vlgmr.msra.gmra.mrb[4].mxu0 %vm263_vm3, %v2566_v62  ;;  %v372_v3 = vsel %vm263_vm3, %v2566_v62, 0.0  ;;  %v1217_v37 = vld [vmem:[%s3157_s5] sm:$0xff] }
 0x204   :  { %2328 = vmatpush3.msra.mxu0 %v587_v34  ;;  %479 = vadd.xlane.f32.xlu0 %v478_v0  ;;  %v1133_v34 = vld [vmem:[%s3156_s4 + $0x10] sm:$0xff]  ;;  %v2498_v39 = vpack.c.bf16 %v1218_v38, %v1217_v37 }
 0x205   :  { %v2568_v5 = vpop.eup %2567  ;;  %v1001_v6 = vmul.f32 1.442695, %v1000_v1  ;;  %373 = vadd.xlane.f32.xlu1 %v372_v3  ;;  %2329 = vmatprep.mubr.msk.f32.mxu0 %vm2666_vm0, %v2667_v4  ;;  %v2477_v41 = vpack.c.bf16 %v1134_v36, %v1133_v34 }
 0x206   :  { %2337 = vmatprep.subr.mxu0 %v2667_v4  ;;  %2334 = vmatprep.mubr.msk.f32.mxu1 %vm2666_vm0, %v2667_v4  ;;  %v583_v8 = vsel %vm263_vm3, %v2568_v5, 0.0  ;;  %v1007_v17 = vpop.permute.xlu0 %1006 }
 0x207   :  { %v2570_v10 = vpop.eup %2569  ;;  %2575 = vpow2.f32 %v1001_v6  ;;  %2330 = vmatmul.mubr.msk.f32.vlgmr.msra.gmra.mrb[6].mxu0 %vm263_vm3, %v2568_v5  ;;  %2342 = vmatprep.subr.mxu1 %v2667_v4 }
 0x208   :  { %2338 = vmatpush3.msra.mxu0 %v797_v35  ;;  %584 = vadd.xlane.f32.xlu0 %v583_v8  ;;  %v688_v11 = vsel %vm263_vm3, %v2570_v10, 0.0  ;;  %v2474_v35 = vpack.c.bf16 %v1132_v20, %v1131_v33 }
 0x209   :  { %v2572_v12 = vpop.eup %2571  ;;  %2335 = vmatmul.mubr.msk.f32.vlgmr.msra.gmra.mrb[6].mxu1 %vm263_vm3, %v2570_v10  ;;  %689 = vadd.xlane.f32.xlu1 %v688_v11 }
 0x20a   :  { %2343 = vmatpush3.msra.mxu1 %v902_v13  ;;  %2339 = vmatprep.mubr.msk.f32.mxu0 %vm2666_vm0, %v2667_v4  ;;  %v793_v15 = vsel %vm263_vm3, %v2572_v12, 0.0 }
 0x20b   :  { %2347 = vmatprep.subr.mxu0 %v2667_v4  ;;  %2340 = vmatmul.mubr.msk.f32.vlgmr.msra.gmra.mrb[8].mxu0 %vm263_vm3, %v2572_v12 }
 0x20c   :  { %v2574_v21 = vpop.eup %2573  ;;  %794 = vadd.xlane.f32.xlu0 %v793_v15  ;;  %2348 = vmatpush3.msra.mxu0 %v1007_v17 }
 0x20d   :  { %2344 = vmatprep.mubr.msk.f32.mxu1 %vm2666_vm0, %v2667_v4  ;;  %v898_v24 = vsel %vm263_vm3, %v2574_v21, 0.0  ;;  %2349 = vmatprep.mubr.msk.f32.mxu0 %vm2666_vm0, %v2667_v4 }
 0x20e   :  { %2345 = vmatmul.mubr.msk.f32.vlgmr.msra.gmra.mrb[8].mxu1 %vm263_vm3, %v2574_v21  ;;  %899 = vadd.xlane.f32.xlu1 %v898_v24 }
 0x20f   :  { %2473 = vmatprep.subr.bf16.mxu1 %v2665_v2  ;;  %2497 = vmatprep.subr.bf16.mxu0 %v2665_v2 }
 0x210   :  { %2384 = vmatprep.mubr.msk.f32.mxu1 %vm2666_vm0, %v2667_v4  ;;  %2475 = vmatpush3.bf16.msra.mxu1 %v2474_v35 }
 0x211   :  { %v2576_v28 = vpop.eup %2575  ;;  %2476 = vmatprep.subr.bf16.mxu1 %v2665_v2 }
 0x212   :  { %271 = vadd.xlane.f32.xlu1 %v270_v29  ;;  %2350 = vmatmul.mubr.msk.f32.vlgmr.msra.gmra.mrb[10].mxu0 %vm263_vm3, %v2576_v28  ;;  %v1003_v32 = vsel %vm263_vm3, %v2576_v28, 0.0 }
 0x213   :  { %1004 = vadd.xlane.f32.xlu0 %v1003_v32  ;;  %2419 = vmatprep.mubr.msk.f32.mxu0 %vm2666_vm0, %v2667_v4 }
 0x214   :  { %2499 = vmatpush3.bf16.msra.mxu0 %v2498_v39  ;;  %2478 = vmatpush3.bf16.msra.mxu1 %v2477_v41  ;;  %v1141_v39 = vld [vmem:[%s3156_s4 + $0x50] sm:$0xff] }
 0x215   :  { %2500 = vmatprep.subr.bf16.mxu0 %v2665_v2  ;;  %2479 = vmatprep.subr.bf16.mxu1 %v2665_v2  ;;  %v2489_v50 = vpack.c.bf16 %v1142_v40, %v1141_v39 }
 0x218   :  { %2502 = vmatpush3.bf16.msra.mxu0 %v2501_v49  ;;  %2481 = vmatpush3.bf16.msra.mxu1 %v2480_v14  ;;  %v1226_v14 = vld [vmem:[%s3157_s5 + $0x48] sm:$0xff] }
 0x219   :  { %2503 = vmatprep.subr.bf16.mxu0 %v2665_v2  ;;  %2482 = vmatprep.subr.bf16.mxu1 %v2665_v2  ;;  %v2510_v59 = vpack.c.bf16 %v1226_v14, %v1225_v51 }
 0x21c   :  { %2505 = vmatpush3.bf16.msra.mxu0 %v2504_v54  ;;  %2484 = vmatpush3.bf16.msra.mxu1 %v2483_v58  ;;  %v1144_v58 = vld [vmem:[%s3156_s4 + $0x68] sm:$0xff] }
 0x21d   :  { %2506 = vmatprep.subr.bf16.mxu0 %v2665_v2  ;;  %2485 = vmatprep.subr.bf16.mxu1 %v2665_v2  ;;  %v2492_v60 = vpack.c.bf16 %v1144_v58, %v1143_v52 }
 0x220   :  { %2508 = vmatpush3.bf16.msra.mxu0 %v2507_v48  ;;  %2487 = vmatpush3.bf16.msra.mxu1 %v2486_v56 }
 0x221   :  { %2509 = vmatprep.subr.bf16.mxu0 %v2665_v2  ;;  %2488 = vmatprep.subr.bf16.mxu1 %v2665_v2 }
 0x224   :  { %2490 = vmatpush3.bf16.msra.mxu1 %v2489_v50  ;;  %2511 = vmatpush3.bf16.msra.mxu0 %v2510_v59 }
 0x225   :  { %2491 = vmatprep.subr.bf16.mxu1 %v2665_v2  ;;  %2512 = vmatprep.subr.bf16.mxu0 %v2665_v2 }
 0x228   :  { %2493 = vmatpush3.bf16.msra.mxu1 %v2492_v60 }
 0x229   :  { %2494 = vmatprep.subr.bf16.mxu1 %v2665_v2 }
 0x291   :  { %v480_v61 = vpop.xlane.xlu0 %479 }
 0x292   :  { %v374_v62 = vpop.xlane.xlu1 %373  ;;  %2577 = vrcp.f32 %v480_v61 }
 0x293   :  { %2579 = vrcp.f32 %v374_v62 }
 0x295   :  { %v585_v63 = vpop.xlane.xlu0 %584 }
 0x296   :  { %v690_v0 = vpop.xlane.xlu1 %689  ;;  %2581 = vrcp.f32 %v585_v63 }
 0x297   :  { %2583 = vrcp.f32 %v690_v0 }
 0x299   :  { %v795_v1 = vpop.xlane.xlu0 %794 }
 0x29a   :  { %2585 = vrcp.f32 %v795_v1  ;;  %v1227_v1 = vld [vmem:[%s3157_s5 + $0x50] sm:$0xff] }
 0x29b   :  { %v900_v6 = vpop.xlane.xlu1 %899 }
 0x29c   :  { %v2578_v8 = vpop.eup %2577  ;;  %2587 = vrcp.f32 %v900_v6 }
 0x29d   :  { %v2580_v11 = vpop.eup %2579 }
 0x2a0   :  { %v1005_v24 = vpop.xlane.xlu0 %1004  ;;  %v2582_v32 = vpop.eup %2581 }
 0x2a1   :  { %2589 = vrcp.f32 %v1005_v24  ;;  %v2584_v37 = vpop.eup %2583 }
 0x2a4   :  { %v2586_v47 = vpop.eup %2585 }
 0x2a6   :  { %v2588_v48 = vpop.eup %2587 }
 0x2d1   :  { %v2943_v3 = vpop.f32.mrb[2].mxu1 }
 0x2d2   :  { %v2316_v5 = vpop.f32.mrb[3].mxu1 }
 0x2d3   :  { %v1228_v5 = vld [vmem:[%s3157_s5 + $0x58] sm:$0xff] }
 0x2d5   :  { %v553_v10 = vpop.f32.mrb[4].mxu1 }
 0x2d6   :  { %v2945_v12 = vmul.f32 %v2578_v8, %v553_v10  ;;  %v448_v13 = vpop.f32.mrb[4].mxu0  ;;  %v2326_v15 = vpop.f32.mrb[5].mxu1  ;;  %v2513_v8 = vpack.c.bf16 %v1228_v5, %v1227_v1 }
 0x2d7   :  { %v2947_v17 = vmul.f32 %v2580_v11, %v448_v13  ;;  %v2321_v21 = vpop.f32.mrb[5].mxu0  ;;  %v1145_v11 = vld [vmem:[%s3156_s4 + $0x70] sm:$0xff]  ;;  %v1146_v13 = vld [vmem:[%s3156_s4 + $0x78] sm:$0xff]  ;;  %v2590_v15 = vpop.eup %2589 }
 0x2d8   :  { %v560_v28 = vmin.f32 %v2945_v12, 0.0  ;;  %v2495_v24 = vpack.c.bf16 %v1146_v13, %v1145_v11  ;;  %2514 = vmatpush3.bf16.msra.mxu0 %v2513_v8  ;;  %vm559_vm11 = vcmp.gt.f32.partialorder %v2945_v12, 0.0 }
 0x2d9   :  { %v455_v29 = vmin.f32 %v2947_v17, 0.0  ;;  %2515 = vmatprep.subr.bf16.mxu0 %v2665_v2  ;;  %vm454_vm12 = vcmp.gt.f32.partialorder %v2947_v17, 0.0 }
 0x2da   :  { %v561_v33 = vmul.f32 1.442695, %v560_v28  ;;  %v658_v20 = vpop.f32.mrb[6].mxu0  ;;  %2496 = vmatpush3.bf16.msra.mxu1 %v2495_v24 }
 0x2db   :  { %v456_v34 = vmul.f32 1.442695, %v455_v29  ;;  %v2951_v35 = vmul.f32 %v2582_v32, %v658_v20  ;;  %v2331_v36 = vpop.f32.mrb[7].mxu0  ;;  %v1229_v20 = vld [vmem:[%s3157_s5 + $0x60] sm:$0xff]  ;;  %2422 = vmatprep.subr.mxu1 %v2667_v4 }
 0x2dc   :  { %2591 = vpow2.f32 %v561_v33  ;;  %v763_v38 = vpop.f32.mrb[6].mxu1 }
 0x2dd   :  { %2593 = vpow2.f32 %v456_v34  ;;  %v665_v41 = vmin.f32 %v2951_v35, 0.0  ;;  %v2960_v45 = vmul.f32 %v2584_v37, %v763_v38  ;;  %v2336_v46 = vpop.f32.mrb[7].mxu1  ;;  %v1230_v34 = vld [vmem:[%s3157_s5 + $0x68] sm:$0xff]  ;;  %vm664_vm13 = vcmp.gt.f32.partialorder %v2951_v35, 0.0 }
 0x2de   :  { %v868_v49 = vpop.f32.mrb[8].mxu0  ;;  %v2516_v38 = vpack.c.bf16 %v1230_v34, %v1229_v20  ;;  %v1231_v46 = vld [vmem:[%s3157_s5 + $0x70] sm:$0xff] }
 0x2df   :  { %v666_v53 = vmul.f32 1.442695, %v665_v41  ;;  %v770_v54 = vmin.f32 %v2960_v45, 0.0  ;;  %v2972_v55 = vmul.f32 %v2586_v47, %v868_v49  ;;  %v2341_v42 = vpop.f32.mrb[9].mxu0  ;;  %v1232_v47 = vld [vmem:[%s3157_s5 + $0x78] sm:$0xff]  ;;  %vm769_vm14 = vcmp.gt.f32.partialorder %v2960_v45, 0.0 }
 0x2e0   :  { %2517 = vmatpush3.bf16.msra.mxu0 %v2516_v38  ;;  %v2519_v51 = vpack.c.bf16 %v1232_v47, %v1231_v46 }
 0x2e1   :  { %2595 = vpow2.f32 %v666_v53  ;;  %v771_v56 = vmul.f32 1.442695, %v770_v54  ;;  %v875_v61 = vmin.f32 %v2972_v55, 0.0  ;;  %v973_v62 = vpop.f32.mrb[8].mxu1  ;;  %2518 = vmatprep.subr.bf16.mxu0 %v2665_v2  ;;  %vm874_vm15 = vcmp.gt.f32.partialorder %v2972_v55, 0.0 }
 0x2e2   :  { %v2979_v63 = vmul.f32 %v2588_v48, %v973_v62  ;;  %v2346_v0 = vpop.f32.mrb[9].mxu1 }
 0x2e3   :  { %2597 = vpow2.f32 %v771_v56  ;;  %v876_v6 = vmul.f32 1.442695, %v875_v61  ;;  %v272_v61 = vpop.xlane.xlu1 %271 }
 0x2e4   :  { %v980_v10 = vmin.f32 %v2979_v63, 0.0  ;;  %2520 = vmatpush3.bf16.msra.mxu0 %v2519_v51  ;;  %vm979_vm2 = vcmp.gt.f32.partialorder %v2979_v63, 0.0 }
 0x2e5   :  { %2599 = vpow2.f32 %v876_v6  ;;  %v1078_v21 = vpop.f32.mrb[10].mxu0  ;;  %2427 = vmatprep.subr.mxu0 %v2667_v4 }
 0x2e6   :  { %v2592_v28 = vpop.eup %2591  ;;  %v981_v29 = vmul.f32 1.442695, %v980_v10  ;;  %v1083_v32 = vmul.f32 %v2590_v15, %v1078_v21  ;;  %v2351_v33 = vpop.f32.mrb[11].mxu0 }
 0x2e7   :  { %v2594_v36 = vpop.eup %2593  ;;  %v2198_v37 = vadd.f32 -1.0, %v2592_v28 }
 0x2e8   :  { %2601 = vpow2.f32 %v981_v29  ;;  %v1085_v39 = vmin.f32 %v1083_v32, 0.0  ;;  %v2196_v40 = vadd.f32 -1.0, %v2594_v36  ;;  %vm1084_vm4 = vcmp.gt.f32.partialorder %v1083_v32, 0.0  ;;  %v1303_v36 = vld [vmem:[%s3158_s6] sm:$0xff]  ;;  %s2683_s6 = smov 104  }
 0x2e9   :  { %v564_v41 = vsel %vm559_vm11, %v2945_v12, %v2198_v37  ;;  %vm1129_vm11 = vcmask 916480  }
 0x2ea   :  { %v1086_v49 = vmul.f32 1.442695, %v1085_v39  ;;  %1095 = vrot.lane.b32.xlu1 %v564_v41, %s2681_s14  ;;  %v459_v50 = vsel %vm454_vm12, %v2947_v17, %v2196_v40 }
 0x2eb   :  { %v2596_v12 = vpop.eup %2595  ;;  %1091 = vrot.lane.b32.xlu0 %v459_v50, %s2682_s15 }
 0x2ec   :  { %2603 = vpow2.f32 %v1086_v49  ;;  %v2200_v14 = vadd.f32 -1.0, %v2596_v12 }
 0x2ed   :  { %v2598_v52 = vpop.eup %2597  ;;  %2605 = vrcp.f32 %v272_v61 }
 0x2ee   :  { %v669_v53 = vsel %vm664_vm13, %v2951_v35, %v2200_v14  ;;  %v2202_v54 = vadd.f32 -1.0, %v2598_v52 }
 0x2ef   :  { %v2600_v42 = vpop.eup %2599  ;;  %1099 = vrot.lane.b32.xlu1 %v669_v53, %s2676_s10 }
 0x2f0   :  { %v774_v17 = vsel %vm769_vm14, %v2960_v45, %v2202_v54  ;;  %v2204_v58 = vadd.f32 -1.0, %v2600_v42 }
 0x2f1   :  { %1103 = vrot.lane.b32.xlu0 %v774_v17, %s2680_s13  ;;  %s2684_s13 = smov 120  }
 0x2f2   :  { %v2602_v2 = vpop.eup %2601  ;;  %v879_v59 = vsel %vm874_vm15, %v2972_v55, %v2204_v58 }
 0x2f3   :  { %1107 = vrot.lane.b32.xlu1 %v879_v59, %s2679_s12  ;;  %v2206_v35 = vadd.f32 -1.0, %v2602_v2 }
 0x2f5   :  { %v984_v60 = vsel %vm979_vm2, %v2979_v63, %v2206_v35 }
 0x2f6   :  { %v2604_v48 = vpop.eup %2603  ;;  %1111 = vrot.lane.b32.xlu0 %v984_v60, %s2675_s3 }
 0x2f7   :  { %v2208_v56 = vadd.f32 -1.0, %v2604_v48  ;;  %v2606_v62 = vpop.eup %2605 }
 0x2f8   :  { %v347_v55 = vmul.f32 %v2606_v62, %v2943_v3 }
 0x2f9   :  { %v1089_v45 = vsel %vm1084_vm4, %v1083_v32, %v2208_v56 }
 0x2fa   :  { %1115 = vrot.lane.b32.xlu1 %v1089_v45, %s2678_s11  ;;  %v349_v0 = vmin.f32 %v347_v55, 0.0  ;;  %vm348_vm5 = vcmp.gt.f32.partialorder %v347_v55, 0.0 }
 0x2fc   :  { %v350_v1 = vmul.f32 1.442695, %v349_v0 }
 0x2fe   :  { %2607 = vpow2.f32 %v350_v1 }
 0x308   :  { %v2608_v5 = vpop.eup %2607 }
 0x309   :  { %v2194_v8 = vadd.f32 -1.0, %v2608_v5 }
 0x30b   :  { %v353_v10 = vsel %vm348_vm5, %v347_v55, %v2194_v8 }
 0x35c   :  { %v1096_v6 = vpop.permute.xlu1 %1095 }
 0x35d   :  { %v1092_v63 = vpop.permute.xlu0 %1091 }
 0x35e   :  { %v1118_v11 = vsel %vm30_vm1, %v353_v10, %v1092_v63 }
 0x35f   :  { %v1120_v21 = vsel %vm1119_vm6, %v1118_v11, %v1096_v6 }
 0x361   :  { %v1100_v13 = vpop.permute.xlu1 %1099 }
 0x362   :  { %v1122_v24 = vsel %vm1121_vm7, %v1120_v21, %v1100_v13 }
 0x363   :  { %v1104_v15 = vpop.permute.xlu0 %1103 }
 0x364   :  { %v1124_v28 = vsel %vm1123_vm8, %v1122_v24, %v1104_v15 }
 0x365   :  { %v1108_v3 = vpop.permute.xlu1 %1107 }
 0x366   :  { %v1126_v29 = vsel %vm1125_vm9, %v1124_v28, %v1108_v3 }
 0x368   :  { %v1112_v32 = vpop.permute.xlu0 %1111 }
 0x369   :  { %v1128_v33 = vsel %vm1127_vm10, %v1126_v29, %v1112_v32 }
 0x36c   :  { %v1116_v20 = vpop.permute.xlu1 %1115 }
 0x36d   :  { %v1130_v34 = vsel %vm1129_vm11, %v1128_v33, %v1116_v20 }
 0x36e   :  { %2385 = vmatmul.mubr.f32.vlgmr.msra.gmra.mrb[10].mxu1 %v1130_v34  ;;  %2420 = vmatmul.mubr.f32.vlgmr.msra.gmra.mrb[12].mxu0 %v1130_v34 }
 0x36f   :  { %2423 = vmatpush3.xpose.msra.mxu1 %v1130_v34  ;;  %2424 = vmatprep.mubr.msk.f32.mxu1 %vm2666_vm0, %v2667_v4 }
 0x370   :  { %2432 = vmatprep.subr.mxu1 %v2667_v4  ;;  %2429 = vmatprep.mubr.msk.f32.mxu0 %vm2666_vm0, %v2667_v4 }
 0x372   :  { %2425 = vmatmul.mubr.f32.vlgmr.msra.gmra.mrb[12].mxu1 %v1303_v36 }
 0x373   :  { %2434 = vmatprep.mubr.msk.f32.mxu1 %vm2666_vm0, %v2667_v4 }
 0x441   :  { %v3043_v37 = vpop.f32.mrb[10].mxu1  ;;  %v1299_v38 = vpop.f32.mrb[12].mxu0 }
 0x442   :  { %v2386_v39 = vpop.f32.mrb[11].mxu1  ;;  %2428 = vmatpush3.msra.mxu0 %v3043_v37  ;;  %1473 = vperm.xlu1 %2553, %v1299_v38   ;;  %v2421_v40 = vpop.f32.mrb[13].mxu0 }
 0x443   :  { %1376 = vperm.xlu0 %2552, %v1299_v38   ;;  %2437 = vmatprep.subr.mxu0 %v2667_v4 }
 0x445   :  { %v3047_v41 = vpop.f32.mrb[12].mxu1 }
 0x446   :  { %2555 = vset.pattern.permute.xlu1 %v2670_v16  ;;  %v2426_v46 = vpop.f32.mrb[13].mxu1  ;;  %v1382_v16 = vrot.slane %v3047_v41, %v257_v27  ;;  %v1880_v56 = vrot.slane %v3047_v41, %v781_v44  ;;  %v1980_v0 = vrot.slane %v3047_v41, %v886_v57  ;;  %v2080_v57 = vrot.slane %v3047_v41, %v991_v7 }
 0x447   :  { %2554 = vset.pattern.permute.xlu0 %v2668_v9  ;;  %1674 = vperm.xlu1 %2555, %v1299_v38   ;;  %v1479_v9 = vrot.slane %v3047_v41, %v360_v31 }
 0x448   :  { %1574 = vperm.xlu0 %2554, %v1299_v38  }
 0x44b   :  { %2556 = vset.pattern.permute.xlu1 %v2672_v18 }
 0x44c   :  { %1594 = vrot.lane.b32.xlu0 %v3043_v37, %s2678_s11  ;;  %1774 = vperm.xlu1 %2556, %v1299_v38   ;;  %s2685_s11 = smov 88  }
 0x44d   :  { %2560 = vset.pattern.permute.xlu0 %v2677_v23 }
 0x450   :  { %1694 = vrot.lane.b32.xlu0 %v3043_v37, %s2683_s6  ;;  %2557 = vset.pattern.permute.xlu1 %v2673_v19 }
 0x451   :  { %1874 = vperm.xlu1 %2557, %v1299_v38  }
 0x455   :  { %2558 = vset.pattern.permute.xlu1 %v2674_v22  ;;  %v1680_v22 = vrot.slane %v3047_v41, %v571_v30 }
 0x456   :  { %1974 = vperm.xlu1 %2558, %v1299_v38  }
 0x45a   :  { %2559 = vset.pattern.permute.xlu1 %v2677_v23  ;;  %v1580_v23 = vrot.slane %v3047_v41, %v466_v26  ;;  %v1780_v26 = vrot.slane %v3047_v41, %v676_v43 }
 0x45b   :  { %2074 = vperm.xlu1 %2559, %v1299_v38  }
 0x45f   :  { %1494 = vrot.lane.b32.xlu1 %v3043_v37, %s2684_s13 }
 0x4c1   :  { %v1474_v18 = vpop.permute.xlu1 %1473 }
 0x4c2   :  { %v1480_v19 = vadd.f32 %v1479_v9, %v1474_v18  ;;  %v1377_v47 = vpop.permute.xlu0 %1376 }
 0x4c3   :  { %v1383_v49 = vadd.f32 %v1382_v16, %v1377_v47 }
 0x4c4   :  { %v1482_v50 = vmul.f32 0.2, %v1480_v19  ;;  %vm1481_vm12 = vcmp.gt.f32.partialorder %v1480_v19, 0.0 }
 0x4c5   :  { %v1385_v51 = vmul.f32 0.2, %v1383_v49  ;;  %vm1384_vm1 = vcmp.gt.f32.partialorder %v1383_v49, 0.0 }
 0x4c6   :  { %v1675_v31 = vpop.permute.xlu1 %1674  ;;  %v3073_v54 = vsel %vm1481_vm12, %v1480_v19, %v1482_v50 }
 0x4c7   :  { %v1681_v12 = vadd.f32 %v1680_v22, %v1675_v31  ;;  %v1575_v14 = vpop.permute.xlu0 %1574  ;;  %v1386_v27 = vsel %vm1384_vm1, %v1383_v49, %v1385_v51  ;;  %v1484_v2 = vsel %vm263_vm3, %v3073_v54, -inf }
 0x4c8   :  { %v1581_v52 = vadd.f32 %v1580_v23, %v1575_v14  ;;  %v1387_v53 = vsel %vm263_vm3, %v1386_v27, -inf }
 0x4c9   :  { %1388 = vmax.xlane.f32.xlu1 %v1387_v53  ;;  %v1683_v42 = vmul.f32 0.2, %v1681_v12  ;;  %vm1682_vm14 = vcmp.gt.f32.partialorder %v1681_v12, 0.0 }
 0x4ca   :  { %v1583_v30 = vmul.f32 0.2, %v1581_v52  ;;  %vm1582_vm13 = vcmp.gt.f32.partialorder %v1581_v52, 0.0 }
 0x4cb   :  { %v1775_v17 = vpop.permute.xlu1 %1774  ;;  %v1684_v48 = vsel %vm1682_vm14, %v1681_v12, %v1683_v42  ;;  %v1595_v29 = vpop.permute.xlu0 %1594 }
 0x4cc   :  { %v1781_v58 = vadd.f32 %v1780_v26, %v1775_v17  ;;  %v1584_v59 = vsel %vm1582_vm13, %v1581_v52, %v1583_v30  ;;  %v1685_v61 = vsel %vm263_vm3, %v1684_v48, -inf }
 0x4cd   :  { %1485 = vmax.xlane.f32.xlu1 %v1484_v2  ;;  %v1585_v35 = vsel %vm263_vm3, %v1584_v59, -inf }
 0x4ce   :  { %v1783_v60 = vmul.f32 0.2, %v1781_v58  ;;  %1586 = vmax.xlane.f32.xlu0 %v1585_v35  ;;  %vm1782_vm15 = vcmp.gt.f32.partialorder %v1781_v58, 0.0 }
 0x4cf   :  { %v1695_v33 = vpop.permute.xlu0 %1694 }
 0x4d0   :  { %v1875_v43 = vpop.permute.xlu1 %1874  ;;  %v1784_v62 = vsel %vm1782_vm15, %v1781_v58, %v1783_v60 }
 0x4d1   :  { %v1881_v45 = vadd.f32 %v1880_v56, %v1875_v43  ;;  %v1785_v5 = vsel %vm263_vm3, %v1784_v62, -inf }
 0x4d2   :  { %1686 = vmax.xlane.f32.xlu0 %v1685_v61 }
 0x4d3   :  { %v1883_v55 = vmul.f32 0.2, %v1881_v45  ;;  %vm1882_vm2 = vcmp.gt.f32.partialorder %v1881_v45, 0.0 }
 0x4d5   :  { %v1975_v1 = vpop.permute.xlu1 %1974  ;;  %v1884_v8 = vsel %vm1882_vm2, %v1881_v45, %v1883_v55 }
 0x4d6   :  { %v1981_v6 = vadd.f32 %v1980_v0, %v1975_v1  ;;  %1786 = vmax.xlane.f32.xlu0 %v1785_v5  ;;  %v1885_v63 = vsel %vm263_vm3, %v1884_v8, -inf }
 0x4d8   :  { %v1983_v44 = vmul.f32 0.2, %v1981_v6  ;;  %vm1982_vm4 = vcmp.gt.f32.partialorder %v1981_v6, 0.0 }
 0x4da   :  { %1886 = vmax.xlane.f32.xlu0 %v1885_v63  ;;  %v2075_v10 = vpop.permute.xlu1 %2074  ;;  %v1984_v11 = vsel %vm1982_vm4, %v1981_v6, %v1983_v44 }
 0x4db   :  { %v1985_v13 = vsel %vm263_vm3, %v1984_v11, -inf  ;;  %v2081_v21 = vadd.f32 %v2080_v57, %v2075_v10 }
 0x4dc   :  { %1986 = vmax.xlane.f32.xlu1 %v1985_v13 }
 0x4dd   :  { %v2083_v24 = vmul.f32 0.2, %v2081_v21  ;;  %vm2082_vm5 = vcmp.gt.f32.partialorder %v2081_v21, 0.0 }
 0x4de   :  { %v1495_v15 = vpop.permute.xlu1 %1494 }
 0x4df   :  { %2433 = vmatpush3.msra.mxu1 %v1495_v15  ;;  %v3100_v3 = vsel %vm2082_vm5, %v2081_v21, %v2083_v24 }
 0x4e0   :  { %2442 = vmatprep.subr.mxu1 %v2667_v4  ;;  %v2085_v28 = vsel %vm263_vm3, %v3100_v3, -inf }
 0x4ed   :  { %1794 = vrot.lane.b32.xlu1 %v3043_v37, %s2675_s3  ;;  %s2686_s3 = smov 72  }
 0x4f0   :  { %1894 = vrot.lane.b32.xlu0 %v3043_v37, %s2685_s11 }
 0x4f4   :  { %1994 = vrot.lane.b32.xlu0 %v3043_v37, %s2679_s12  ;;  %s2687_s12 = smov [#allocation2]  }
 0x4f5   :  { %s2181_s14 = sshll.u32 %s2687_s12, 4  ;;  %s2182_s14 = int_to_ptr.vmem [resolvable:$true] %s2181_s14 }
 0x4f6   :  { %s2641_s15 = scalar_lea.vmem %s2182_s14, 128  ;;  %p2646_p1 = scmp.lt.s32.totalorder %s2182_s14, %s2182_s14 }
 0x4f7   :  { %p2642_p0 = scmp.ne.s32.totalorder %s2182_s14, %s2641_s15  ;;  %p2647_p2 = scmp.lt.s32.totalorder %s2641_s15, %s2641_s15 }
 0x4f9   :  { %p2648_p3 = por %p2647_p2, %p2646_p1 }
 0x4fb   :  { %p2649_p4 = pnand %p2648_p3, %p2642_p0 }
 0x513   :  { %2086 = vmax.xlane.f32.xlu0 %v2085_v28 }
 0x529   :  { %2094 = vrot.lane.b32.xlu0 %v3043_v37, %s2686_s3 }
 0x556   :  { %v1389_v32 = vpop.xlane.xlu1 %1388 }
 0x557   :  { %v1390_v20 = vsub.f32 %v1386_v27, %v1389_v32 }
 0x559   :  { %v1391_v34 = vmul.f32 1.442695, %v1390_v20 }
 0x55a   :  { %v1486_v25 = vpop.xlane.xlu1 %1485 }
 0x55b   :  { %2609 = vpow2.f32 %v1391_v34  ;;  %v1487_v7 = vsub.f32 %v3073_v54, %v1486_v25  ;;  %v1587_v36 = vpop.xlane.xlu0 %1586 }
 0x55c   :  { %v1588_v38 = vsub.f32 %v1584_v59, %v1587_v36 }
 0x55d   :  { %v1488_v39 = vmul.f32 1.442695, %v1487_v7 }
 0x55e   :  { %v1589_v40 = vmul.f32 1.442695, %v1588_v38 }
 0x55f   :  { %2611 = vpow2.f32 %v1488_v39  ;;  %v1687_v41 = vpop.xlane.xlu0 %1686 }
 0x560   :  { %2613 = vpow2.f32 %v1589_v40  ;;  %v1688_v46 = vsub.f32 %v1684_v48, %v1687_v41 }
 0x562   :  { %v1689_v9 = vmul.f32 1.442695, %v1688_v46 }
 0x563   :  { %v1787_v16 = vpop.xlane.xlu0 %1786 }
 0x564   :  { %2615 = vpow2.f32 %v1689_v9  ;;  %v1788_v37 = vsub.f32 %v1784_v62, %v1787_v16 }
 0x565   :  { %v2610_v18 = vpop.eup %2609 }
 0x566   :  { %v1789_v19 = vmul.f32 1.442695, %v1788_v37  ;;  %2430 = vmatmul.mubr.msk.f32.vlgmr.msra.gmra.mrb[14].mxu0 %vm263_vm3, %v2610_v18  ;;  %v1393_v47 = vsel %vm263_vm3, %v2610_v18, 0.0 }
 0x567   :  { %2438 = vmatpush3.msra.mxu0 %v1595_v29  ;;  %1394 = vadd.xlane.f32.xlu0 %v1393_v47  ;;  %v1887_v49 = vpop.xlane.xlu0 %1886 }
 0x568   :  { %2617 = vpow2.f32 %v1789_v19  ;;  %v1888_v22 = vsub.f32 %v1884_v8, %v1887_v49  ;;  %2439 = vmatprep.mubr.msk.f32.mxu0 %vm2666_vm0, %v2667_v4  ;;  %2447 = vmatprep.subr.mxu0 %v2667_v4 }
 0x569   :  { %v2612_v23 = vpop.eup %2611  ;;  %v1987_v50 = vpop.xlane.xlu1 %1986 }
 0x56a   :  { %v2614_v51 = vpop.eup %2613  ;;  %v1889_v31 = vmul.f32 1.442695, %v1888_v22  ;;  %2435 = vmatmul.mubr.msk.f32.vlgmr.msra.gmra.mrb[14].mxu1 %vm263_vm3, %v2612_v23  ;;  %v1988_v12 = vsub.f32 %v1984_v11, %v1987_v50  ;;  %v1490_v14 = vsel %vm263_vm3, %v2612_v23, 0.0 }
 0x56b   :  { %2443 = vmatpush3.msra.mxu1 %v1695_v33  ;;  %1491 = vadd.xlane.f32.xlu0 %v1490_v14  ;;  %v1895_v52 = vpop.permute.xlu0 %1894  ;;  %v1591_v42 = vsel %vm263_vm3, %v2614_v51, 0.0 }
 0x56c   :  { %2619 = vpow2.f32 %v1889_v31  ;;  %v1989_v27 = vmul.f32 1.442695, %v1988_v12  ;;  %2440 = vmatmul.mubr.msk.f32.vlgmr.msra.gmra.mrb[16].mxu0 %vm263_vm3, %v2614_v51  ;;  %2444 = vmatprep.mubr.msk.f32.mxu1 %vm2666_vm0, %v2667_v4 }
 0x56d   :  { %v1795_v53 = vpop.permute.xlu1 %1794  ;;  %2452 = vmatprep.subr.mxu1 %v2667_v4  ;;  %2449 = vmatprep.mubr.msk.f32.mxu0 %vm2666_vm0, %v2667_v4 }
 0x56e   :  { %v2616_v54 = vpop.eup %2615  ;;  %2621 = vpow2.f32 %v1989_v27  ;;  %2448 = vmatpush3.msra.mxu0 %v1795_v53 }
 0x56f   :  { %1592 = vadd.xlane.f32.xlu0 %v1591_v42  ;;  %2445 = vmatmul.mubr.msk.f32.vlgmr.msra.gmra.mrb[16].mxu1 %vm263_vm3, %v2616_v54  ;;  %v1691_v26 = vsel %vm263_vm3, %v2616_v54, 0.0  ;;  %v1995_v17 = vpop.permute.xlu0 %1994 }
 0x570   :  { %2453 = vmatpush3.msra.mxu1 %v1895_v52  ;;  %2457 = vmatprep.subr.mxu0 %v2667_v4 }
 0x571   :  { %2454 = vmatprep.mubr.msk.f32.mxu1 %vm2666_vm0, %v2667_v4  ;;  %2462 = vmatprep.subr.mxu1 %v2667_v4 }
 0x572   :  { %v2618_v30 = vpop.eup %2617 }
 0x573   :  { %1692 = vadd.xlane.f32.xlu0 %v1691_v26  ;;  %2450 = vmatmul.mubr.msk.f32.vlgmr.msra.gmra.mrb[18].mxu0 %vm263_vm3, %v2618_v30  ;;  %v1791_v58 = vsel %vm263_vm3, %v2618_v30, 0.0 }
 0x574   :  { %2458 = vmatpush3.msra.mxu0 %v1995_v17  ;;  %1792 = vadd.xlane.f32.xlu1 %v1791_v58 }
 0x575   :  { %2459 = vmatprep.mubr.msk.f32.mxu0 %vm2666_vm0, %v2667_v4 }
 0x576   :  { %v2620_v2 = vpop.eup %2619 }
 0x577   :  { %2455 = vmatmul.mubr.msk.f32.vlgmr.msra.gmra.mrb[18].mxu1 %vm263_vm3, %v2620_v2  ;;  %v1891_v59 = vsel %vm263_vm3, %v2620_v2, 0.0 }
 0x578   :  { %v2622_v35 = vpop.eup %2621  ;;  %1892 = vadd.xlane.f32.xlu0 %v1891_v59  ;;  %2464 = vmatprep.mubr.msk.f32.mxu1 %vm2666_vm0, %v2667_v4 }
 0x579   :  { %2460 = vmatmul.mubr.msk.f32.vlgmr.msra.gmra.mrb[20].mxu0 %vm263_vm3, %v2622_v35  ;;  %v1991_v60 = vsel %vm263_vm3, %v2622_v35, 0.0 }
 0x57c   :  { %1992 = vadd.xlane.f32.xlu0 %v1991_v60 }
 0x5a0   :  { %v2087_v48 = vpop.xlane.xlu0 %2086 }
 0x5a1   :  { %v2088_v56 = vsub.f32 %v3100_v3, %v2087_v48 }
 0x5a3   :  { %v2089_v43 = vmul.f32 1.442695, %v2088_v56 }
 0x5a4   :  { %v2095_v45 = vpop.permute.xlu0 %2094 }
 0x5a5   :  { %2623 = vpow2.f32 %v2089_v43  ;;  %2463 = vmatpush3.msra.mxu1 %v2095_v45 }
 0x5af   :  { %v2624_v61 = vpop.eup %2623 }
 0x5b0   :  { %2465 = vmatmul.mubr.msk.f32.vlgmr.msra.gmra.mrb[20].mxu1 %vm263_vm3, %v2624_v61  ;;  %v2091_v62 = vsel %vm263_vm3, %v2624_v61, 0.0 }
 0x5b1   :  { %2092 = vadd.xlane.f32.xlu0 %v2091_v62 }
 0x5f4   :  { %v1395_v55 = vpop.xlane.xlu0 %1394 }
 0x5f5   :  { %2625 = vrcp.f32 %v1395_v55 }
 0x5f8   :  { %v1492_v4 = vpop.xlane.xlu0 %1491 }
 0x5f9   :  { %2627 = vrcp.f32 %v1492_v4 }
 0x5fc   :  { %v1593_v0 = vpop.xlane.xlu0 %1592 }
 0x5fd   :  { %2629 = vrcp.f32 %v1593_v0 }
 0x5ff   :  { %v2626_v63 = vpop.eup %2625 }
 0x600   :  { %v1693_v1 = vpop.xlane.xlu0 %1692 }
 0x601   :  { %2631 = vrcp.f32 %v1693_v1  ;;  %v1793_v5 = vpop.xlane.xlu1 %1792 }
 0x602   :  { %2633 = vrcp.f32 %v1793_v5 }
 0x603   :  { %v2628_v10 = vpop.eup %2627 }
 0x605   :  { %v1893_v6 = vpop.xlane.xlu0 %1892 }
 0x606   :  { %2635 = vrcp.f32 %v1893_v6 }
 0x607   :  { %v2630_v21 = vpop.eup %2629 }
 0x609   :  { %v1993_v24 = vpop.xlane.xlu0 %1992 }
 0x60a   :  { %2637 = vrcp.f32 %v1993_v24 }
 0x60b   :  { %v2632_v33 = vpop.eup %2631 }
 0x60c   :  { %v2634_v38 = vpop.eup %2633 }
 0x610   :  { %v2636_v9 = vpop.eup %2635 }
 0x614   :  { %v2638_v19 = vpop.eup %2637 }
 0x639   :  { %v1465_v8 = vpop.f32.mrb[14].mxu0 }
 0x63a   :  { %v2431_v44 = vpop.f32.mrb[15].mxu0  ;;  %v1470_v13 = vmul.f32 %v2626_v63, %v1465_v8 }
 0x63d   :  { %v1566_v11 = vpop.f32.mrb[14].mxu1 }
 0x63e   :  { %v1571_v15 = vmul.f32 %v2628_v10, %v1566_v11  ;;  %v2436_v57 = vpop.f32.mrb[15].mxu1  ;;  %v2093_v51 = vpop.xlane.xlu0 %2092 }
 0x63f   :  { %v1666_v3 = vpop.f32.mrb[16].mxu0  ;;  %2639 = vrcp.f32 %v2093_v51 }
 0x640   :  { %v1572_v28 = vadd.f32 %v1571_v15, %v1470_v13  ;;  %v1671_v29 = vmul.f32 %v2630_v21, %v1666_v3  ;;  %v2441_v32 = vpop.f32.mrb[17].mxu0 }
 0x642   :  { %v1672_v20 = vadd.f32 %v1671_v29, %v1572_v28  ;;  %v1766_v34 = vpop.f32.mrb[16].mxu1 }
 0x643   :  { %v1771_v25 = vmul.f32 %v2632_v33, %v1766_v34  ;;  %v2446_v7 = vpop.f32.mrb[17].mxu1 }
 0x645   :  { %v1772_v36 = vadd.f32 %v1771_v25, %v1672_v20 }
 0x646   :  { %v1866_v39 = vpop.f32.mrb[18].mxu0 }
 0x647   :  { %v1871_v40 = vmul.f32 %v2634_v38, %v1866_v39  ;;  %v2451_v41 = vpop.f32.mrb[19].mxu0 }
 0x649   :  { %v1872_v46 = vadd.f32 %v1871_v40, %v1772_v36  ;;  %v2640_v31 = vpop.eup %2639 }
 0x64a   :  { %v1966_v16 = vpop.f32.mrb[18].mxu1 }
 0x64b   :  { %v1971_v37 = vmul.f32 %v2636_v9, %v1966_v16  ;;  %v2456_v18 = vpop.f32.mrb[19].mxu1 }
 0x64c   :  { %v2066_v47 = vpop.f32.mrb[20].mxu0 }
 0x64d   :  { %v1972_v49 = vadd.f32 %v1971_v37, %v1872_v46  ;;  %v2071_v22 = vmul.f32 %v2638_v19, %v2066_v47  ;;  %v2461_v23 = vpop.f32.mrb[21].mxu0 }
 0x64f   :  { %v2072_v50 = vadd.f32 %v2071_v22, %v1972_v49 }
 0x683   :  { %v2166_v12 = vpop.f32.mrb[20].mxu1 }
 0x684   :  { %v2171_v14 = vmul.f32 %v2640_v31, %v2166_v12  ;;  %v2466_v27 = vpop.f32.mrb[21].mxu1 }
 0x686   :  { %v2172_v52 = vadd.f32 %v2171_v14, %v2072_v50 }
 0x688   :  { %v2173_v53 = vmul.f32 0.125, %v2172_v52 }
 0x68a   :  { %2174 = vst.msk [vmem:[#allocation2] sm:$0xff] %vm263_vm3, %v2173_v53 }
 0x68b   :  { %2652 = shalt.err (!%p2649_p4)
}
 0x68c   :  { %s2653_s21 = scalar_lea.hbm %s3159_s7, 128 }
 0x68d   :  { %p2654_p5 = scmp.ne.s32.totalorder %s3159_s7, %s2653_s21  ;;  %p2657_p6 = scmp.lt.u32.totalorder %s2653_s21, %s3159_s7 }
 0x68f   :  { %p2659_p7 = pnand %p2657_p6, %p2654_p5 }
 0x691   :  { %2662 = shalt.err (!%p2659_p7)
}
 0x692   :  { %2184 = dma.vmem_to_hbm [thread:$0]  %s2182_s14, 128, %s3159_s7, [#allocation3]  }
 0x693   :  { %2663 = dma.done.wait [#allocation3], 128  }
 0x694   :  { %2664 = vsyncadd [#allocation3], 4294967168 }
 0x695   :  { %2188 = vsyncpa [#allocation3], 1 }

</bundles_post_ra>
